<compile_context>
chip_gen: v5e
topology: v5e:2x2
jax: 0.10.0
libtpu: 0.0.40
codegen_flags: <defaults>
</compile_context>

<pallas_src>
import math
import functools

import jax
import jax.numpy as jnp
import numpy as np
from jax import lax
from jax.experimental import pallas as pl
from jax.experimental.pallas import tpu as pltpu


def _layernorm(x, gamma, beta, eps):
    # PyTorch LayerNorm: biased variance, eps inside the sqrt.  Kept in f32.
    mean = jnp.mean(x, axis=-1, keepdims=True)
    var = jnp.mean((x - mean) ** 2, axis=-1, keepdims=True)
    return (x - mean) * lax.rsqrt(var + eps) * gamma + beta


def _gelu_exact(x):
    # F.gelu default (exact, erf-based).
    return 0.5 * x * (1.0 + lax.erf(x * (1.0 / math.sqrt(2.0))))


def _recip(x):
    # EUP approximate reciprocal (free slot); fall back to a divide if absent.
    if hasattr(pl, "reciprocal"):
        return pl.reciprocal(x, approx=True)
    return 1.0 / x


def gpt2_block_kernel(
    x_ref,                 # (1, S, H) f32   full-sequence x (resident per batch)
    ln1g_ref, ln1b_ref,    # (1, H) f32
    wq_ref, bq_ref,        # (H, H) bf16, (1, H) f32
    wk_ref, bk_ref,        # (H, H) bf16, (1, H) f32
    wv_ref, bv_ref,        # (H, H) bf16, (1, H) f32
    wproj_ref, bproj_ref,  # (H, H) bf16, (1, H) f32
    ln2g_ref, ln2b_ref,    # (1, H) f32
    w1_ref, b1_ref,        # (n_mc, H, mc) bf16, (n_mc, 1, mc) f32
    w2_ref, b2_ref,        # (n_mc, mc, H) bf16, (1, H) f32
    o_ref,                 # (1, TS, H)
    k_scratch, v_scratch,  # (S, H) bf16  lane-dense persistent K/V cache
    q_scratch,             # (TS, H) bf16 (scaled Q; later reused for ln_2(y))
    cat_scratch,           # (TS, H) bf16 concatenated head outputs
    acc_scratch,           # (TS, H) f32  MLP accumulator (residual folded in)
    *, num_heads, head_size, q_tile, ln_eps,
):
    nh, hs, TS = num_heads, head_size, q_tile
    H = x_ref.shape[2]
    qi = pl.program_id(1)
    bf16, f32 = jnp.bfloat16, jnp.float32
    inv_sqrt_d = 1.0 / math.sqrt(hs)

    ln1g = ln1g_ref[...]
    ln1b = ln1b_ref[...]

    # ---- K / V for the whole sequence: once per batch, chunked over rows,
    # ---- stored lane-dense (S, H) bf16 in persistent VMEM scratch. ----
    @pl.when(qi == 0)
    def _compute_kv():
        def kv_chunk(c, carry):
            r = pl.multiple_of(c * TS, 8)
            xc = x_ref[0, pl.ds(r, TS), :]                               # (TS, H) f32
            xcn = _layernorm(xc, ln1g, ln1b, ln_eps).astype(bf16)
            k_scratch[pl.ds(r, TS), :] = (
                jnp.dot(xcn, wk_ref[...], preferred_element_type=f32) + bk_ref[...]
            ).astype(bf16)
            v_scratch[pl.ds(r, TS), :] = (
                jnp.dot(xcn, wv_ref[...], preferred_element_type=f32) + bv_ref[...]
            ).astype(bf16)
            return carry
        lax.fori_loop(0, pl.num_programs(1), kv_chunk, 0)

    # ---- Q for this query tile (1/sqrt(hs) folded in once, stored lane-dense) ----
    q_start = pl.multiple_of(qi * TS, 8)
    xq = x_ref[0, pl.ds(q_start, TS), :]                                 # (TS, H) f32
    xqn = _layernorm(xq, ln1g, ln1b, ln_eps).astype(bf16)
    qv = jnp.dot(xqn, wq_ref[...], preferred_element_type=f32) + bq_ref[...]
    q_scratch[...] = (qv * inv_sqrt_d).astype(bf16)

    # ---- attention: per head, flash-style over key blocks, causal skipping ----
    row = lax.broadcasted_iota(jnp.int32, (TS, TS), 0)
    col = lax.broadcasted_iota(jnp.int32, (TS, TS), 1)
    for h in range(nh):                           # static loop -> static lane slices
        lo = h * hs
        q_h = q_scratch[:, lo:lo + hs]            # (TS, hs) bf16

        def kv_body(kb, carry, lo=lo, q_h=q_h):
            m_i, l_i, acc = carry
            r = pl.multiple_of(kb * TS, 8)
            k_blk = k_scratch[pl.ds(r, TS), lo:lo + hs]                  # (TS, hs) bf16
            v_blk = v_scratch[pl.ds(r, TS), lo:lo + hs]
            s = jnp.dot(q_h, k_blk.T, preferred_element_type=f32)        # (TS, TS) f32
            # causal mask (matches triu(ones, diagonal=1) * -10000) — only the
            # diagonal block needs it; blocks kb < qi are fully visible.
            s = jnp.where(jnp.logical_and(kb == qi, col > row), -10000.0, s)
            m_new = jnp.maximum(m_i, jnp.max(s, axis=-1, keepdims=True))
            alpha = jnp.exp(m_i - m_new)
            p = jnp.exp(s - m_new)
            l_new = alpha * l_i + jnp.sum(p, axis=-1, keepdims=True)
            acc_new = alpha * acc + jnp.dot(p.astype(bf16), v_blk,
                                            preferred_element_type=f32)
            return m_new, l_new, acc_new

        init = (jnp.full((TS, 1), -1e30, f32),
                jnp.zeros((TS, 1), f32),
                jnp.zeros((TS, hs), f32))
        # only key blocks 0..qi are touched: above-diagonal work is skipped
        m_i, l_i, acc = lax.fori_loop(0, qi + 1, kv_body, init)
        cat_scratch[:, lo:lo + hs] = (acc * _recip(l_i)).astype(bf16)

    # ---- c_proj: ONE full-depth (TS,H)@(H,H) matmul over the concatenated heads ----
    attn = jnp.dot(cat_scratch[...], wproj_ref[...],
                   preferred_element_type=f32) + bproj_ref[...]          # (TS, H) f32

    # ---- residual 1 (x re-read from the resident VMEM block; not kept live) ----
    y = attn + x_ref[0, pl.ds(q_start, TS), :]

    # ---- ln_2 + MLP (fori_loop over 4H chunks, VMEM f32 accumulator) + residual 2 ----
    q_scratch[...] = _layernorm(y, ln2g_ref[...], ln2b_ref[...], ln_eps).astype(bf16)
    acc_scratch[...] = y                          # residual folded into the accumulator

    def mlp_body(c, carry):
        h1 = jnp.dot(q_scratch[...], w1_ref[c],
                     preferred_element_type=f32) + b1_ref[c]             # (TS, mc) f32
        h1 = _gelu_exact(h1)
        acc_scratch[...] += jnp.dot(h1.astype(bf16), w2_ref[c],
                                    preferred_element_type=f32)
        return carry
    lax.fori_loop(0, w1_ref.shape[0], mlp_body, 0)

    # dropout is identity in eval mode
    o_ref[0] = (acc_scratch[...] + b2_ref[...]).astype(o_ref.dtype)


def gpt2_block(x, params, *, num_heads, ln_eps, q_tile=None, mlp_chunk=None):
    B, S, H = x.shape
    assert H % num_heads == 0
    hs = H // num_heads

    # Query-row tiling: more grid steps for pipelining / VMEM control.
    if q_tile is None:
        q_tile = 128 if (S > 128 and S % 128 == 0) else S
    assert S % q_tile == 0 and q_tile % 8 == 0
    n_qt = S // q_tile

    FF = params["w1"].shape[1]
    if mlp_chunk is None:
        mlp_chunk = 512 if (FF > 512 and FF % 512 == 0) else FF
    assert FF % mlp_chunk == 0
    n_mc = FF // mlp_chunk

    bf16, f32 = jnp.bfloat16, jnp.float32
    wqkv, bqkv = params["wqkv"], params["bqkv"]

    # MLP weights reshaped so the chunk index is a leading dim (clean dynamic
    # indexing inside the fori_loop; chunk c == original lane slice c*mc:(c+1)*mc).
    w1r = params["w1"].reshape(H, n_mc, mlp_chunk).transpose(1, 0, 2)    # (n_mc, H, mc)
    b1r = params["b1"].reshape(1, n_mc, mlp_chunk).transpose(1, 0, 2)    # (n_mc, 1, mc)
    w2r = params["w2"].reshape(n_mc, mlp_chunk, H)                       # (n_mc, mc, H)

    weight_args = (
        params["ln1_g"].astype(f32), params["ln1_b"].astype(f32),
        wqkv[:, :H].astype(bf16),        bqkv[:, :H].astype(f32),        # Q proj
        wqkv[:, H:2 * H].astype(bf16),   bqkv[:, H:2 * H].astype(f32),   # K proj
        wqkv[:, 2 * H:].astype(bf16),    bqkv[:, 2 * H:].astype(f32),    # V proj
        params["wproj"].astype(bf16),    params["bproj"].astype(f32),    # c_proj (full H x H)
        params["ln2_g"].astype(f32), params["ln2_b"].astype(f32),
        w1r.astype(bf16), b1r.astype(f32),
        w2r.astype(bf16), params["b2"].astype(f32),
    )

    def _full(arr):
        nd = arr.ndim
        return pl.BlockSpec(arr.shape, lambda b, q, _nd=nd: (0,) * _nd)

    kernel = functools.partial(
        gpt2_block_kernel,
        num_heads=num_heads, head_size=hs, q_tile=q_tile, ln_eps=ln_eps,
    )

    # Raise the scoped-VMEM limit (default is too small at real sizes), staying
    # under each generation's physical capacity.
    try:
        vmem_cap = pltpu.get_tpu_info().vmem_capacity_bytes
    except Exception:
        vmem_cap = 64 * 1024 * 1024
    vmem_limit = min(int(vmem_cap * 3 // 4), 100 * 1024 * 1024)

    return pl.pallas_call(
        kernel,
        out_shape=jax.ShapeDtypeStruct((B, S, H), x.dtype),
        grid_spec=pltpu.PrefetchScalarGridSpec(
            num_scalar_prefetch=0,
            grid=(B, n_qt),
            in_specs=[
                pl.BlockSpec((1, S, H), lambda b, q: (b, 0, 0)),   # full-seq x (resident)
            ] + [_full(w) for w in weight_args],
            out_specs=pl.BlockSpec((1, q_tile, H), lambda b, q: (b, q, 0)),
            scratch_shapes=[
                pltpu.VMEM((S, H), bf16),        # K cache, lane-dense (per batch)
                pltpu.VMEM((S, H), bf16),        # V cache, lane-dense (per batch)
                pltpu.VMEM((q_tile, H), bf16),   # scaled Q / reused for ln_2(y)
                pltpu.VMEM((q_tile, H), bf16),   # concatenated head outputs
                pltpu.VMEM((q_tile, H), f32),    # MLP accumulator
            ],
        ),
        compiler_params=pltpu.CompilerParams(
            # K/V caching requires the q axis to be "arbitrary" (qi==0 first per batch).
            dimension_semantics=("parallel", "arbitrary"),
            vmem_limit_bytes=vmem_limit,
        ),
    )(x, *weight_args)


# ----------------------- pure-JAX reference (for checking) -----------------------
def gpt2_block_ref(x, params, *, num_heads, ln_eps):
    B, S, H = x.shape
    hs = H // num_heads

    def ln(x, g, b):
        mu = jnp.mean(x, axis=-1, keepdims=True)
        var = jnp.mean((x - mu) ** 2, axis=-1, keepdims=True)
        return (x - mu) / jnp.sqrt(var + ln_eps) * g + b

    xn = ln(x, params["ln1_g"], params["ln1_b"])
    qkv = xn @ params["wqkv"] + params["bqkv"]
    q, k, v = jnp.split(qkv, 3, axis=-1)
    q = q.reshape(B, S, num_heads, hs).transpose(0, 2, 1, 3)
    k = k.reshape(B, S, num_heads, hs).transpose(0, 2, 1, 3)
    v = v.reshape(B, S, num_heads, hs).transpose(0, 2, 1, 3)
    scores = jnp.einsum("bhqn,bhkn->bhqk", q, k) / math.sqrt(hs)
    mask = jnp.triu(jnp.ones((S, S), jnp.float32), k=1)
    masked = scores * (1 - mask) - 10000.0 * mask
    w = jax.nn.softmax(masked, axis=-1)
    o = jnp.einsum("bhqk,bhkn->bhqn", w, v).transpose(0, 2, 1, 3).reshape(B, S, H)
    attn = o @ params["wproj"] + params["bproj"]
    y = attn + x
    yn = ln(y, params["ln2_g"], params["ln2_b"])
    h1 = yn @ params["w1"] + params["b1"]
    h1 = 0.5 * h1 * (1.0 + lax.erf(h1 / math.sqrt(2.0)))
    h2 = h1 @ params["w2"] + params["b2"]
    return h2 + y


if __name__ == "__main__":
    # Small shapes; q_tile / mlp_chunk chosen to exercise the multi-tile causal
    # path, the chunked K/V build and the chunked-MLP fori_loop.
    B, S, H, NH = 2, 16, 32, 4
    LN_EPS = 1e-5
    dt = jnp.float32

    key = jax.random.PRNGKey(0)
    ks = jax.random.split(key, 8)

    # Deterministic synthetic parameters (nn.Linear-like scale).
    # Linear weights stored as (in, out); 1-D params stored as (1, D).
    params = {
        "ln1_g": jnp.ones((1, H), dt),
        "ln1_b": jnp.zeros((1, H), dt),
        "wqkv": (0.02 * jax.random.normal(ks[0], (H, 3 * H))).astype(dt),
        "bqkv": (0.02 * jax.random.normal(ks[1], (1, 3 * H))).astype(dt),
        "wproj": (0.02 * jax.random.normal(ks[2], (H, H))).astype(dt),
        "bproj": (0.02 * jax.random.normal(ks[3], (1, H))).astype(dt),
        "ln2_g": jnp.ones((1, H), dt),
        "ln2_b": jnp.zeros((1, H), dt),
        "w1": (0.02 * jax.random.normal(ks[4], (H, 4 * H))).astype(dt),
        "b1": (0.02 * jax.random.normal(ks[5], (1, 4 * H))).astype(dt),
        "w2": (0.02 * jax.random.normal(ks[6], (4 * H, H))).astype(dt),
        "b2": (0.02 * jax.random.normal(ks[7], (1, H))).astype(dt),
    }

    x = jax.random.normal(jax.random.PRNGKey(42), (B, S, H), dt)

    out = gpt2_block(x, params, num_heads=NH, ln_eps=LN_EPS, q_tile=8, mlp_chunk=64)
    out = jax.block_until_ready(out)

    ref = gpt2_block_ref(x, params, num_heads=NH, ln_eps=LN_EPS)
    # bf16 matmul operands (f32 accumulation), online softmax and approx
    # reciprocal -> looser tolerance.
    np.testing.assert_allclose(np.asarray(out), np.asarray(ref), rtol=5e-3, atol=5e-3)

    print("KERNEL_OK")
</pallas_src>

<mosaic_0001>
module attributes {stable_mosaic.version = 11 : i64} {
  func.func @gpt2_block_kernel(%arg0: i32, %arg1: i32, %arg2: memref<1x16x32xf32, #tpu.memory_space<vmem>>, %arg3: memref<1x32xf32, #tpu.memory_space<vmem>>, %arg4: memref<1x32xf32, #tpu.memory_space<vmem>>, %arg5: memref<32x32xbf16, #tpu.memory_space<vmem>>, %arg6: memref<1x32xf32, #tpu.memory_space<vmem>>, %arg7: memref<32x32xbf16, #tpu.memory_space<vmem>>, %arg8: memref<1x32xf32, #tpu.memory_space<vmem>>, %arg9: memref<32x32xbf16, #tpu.memory_space<vmem>>, %arg10: memref<1x32xf32, #tpu.memory_space<vmem>>, %arg11: memref<32x32xbf16, #tpu.memory_space<vmem>>, %arg12: memref<1x32xf32, #tpu.memory_space<vmem>>, %arg13: memref<1x32xf32, #tpu.memory_space<vmem>>, %arg14: memref<1x32xf32, #tpu.memory_space<vmem>>, %arg15: memref<2x32x64xbf16, #tpu.memory_space<vmem>>, %arg16: memref<2x1x64xf32, #tpu.memory_space<vmem>>, %arg17: memref<2x64x32xbf16, #tpu.memory_space<vmem>>, %arg18: memref<1x32xf32, #tpu.memory_space<vmem>>, %arg19: memref<1x8x32xf32, #tpu.memory_space<vmem>>, %arg20: memref<16x32xbf16, #tpu.memory_space<vmem>>, %arg21: memref<16x32xbf16, #tpu.memory_space<vmem>>, %arg22: memref<8x32xbf16, #tpu.memory_space<vmem>>, %arg23: memref<8x32xbf16, #tpu.memory_space<vmem>>, %arg24: memref<8x32xf32, #tpu.memory_space<vmem>>) attributes {dimension_semantics = [#tpu.dimension_semantics<parallel>, #tpu.dimension_semantics<arbitrary>], iteration_bounds = array<i64: 2, 2>, scalar_prefetch = 0 : i64, scratch_operands = 5 : i64, tpu.core_type = #tpu.core_type<tc>, window_params = [{transform_indices = @transform_0, window_bounds = array<i64: 1, 16, 32>}, {pipeline_mode = #tpu.pipeline_mode<synchronous>, transform_indices = @transform_1, window_bounds = array<i64: 1, 32>}, {pipeline_mode = #tpu.pipeline_mode<synchronous>, transform_indices = @transform_2, window_bounds = array<i64: 1, 32>}, {pipeline_mode = #tpu.pipeline_mode<synchronous>, transform_indices = @transform_3, window_bounds = array<i64: 32, 32>}, {pipeline_mode = #tpu.pipeline_mode<synchronous>, transform_indices = @transform_4, window_bounds = array<i64: 1, 32>}, {pipeline_mode = #tpu.pipeline_mode<synchronous>, transform_indices = @transform_5, window_bounds = array<i64: 32, 32>}, {pipeline_mode = #tpu.pipeline_mode<synchronous>, transform_indices = @transform_6, window_bounds = array<i64: 1, 32>}, {pipeline_mode = #tpu.pipeline_mode<synchronous>, transform_indices = @transform_7, window_bounds = array<i64: 32, 32>}, {pipeline_mode = #tpu.pipeline_mode<synchronous>, transform_indices = @transform_8, window_bounds = array<i64: 1, 32>}, {pipeline_mode = #tpu.pipeline_mode<synchronous>, transform_indices = @transform_9, window_bounds = array<i64: 32, 32>}, {pipeline_mode = #tpu.pipeline_mode<synchronous>, transform_indices = @transform_10, window_bounds = array<i64: 1, 32>}, {pipeline_mode = #tpu.pipeline_mode<synchronous>, transform_indices = @transform_11, window_bounds = array<i64: 1, 32>}, {pipeline_mode = #tpu.pipeline_mode<synchronous>, transform_indices = @transform_12, window_bounds = array<i64: 1, 32>}, {pipeline_mode = #tpu.pipeline_mode<synchronous>, transform_indices = @transform_13, window_bounds = array<i64: 2, 32, 64>}, {pipeline_mode = #tpu.pipeline_mode<synchronous>, transform_indices = @transform_14, window_bounds = array<i64: 2, 1, 64>}, {pipeline_mode = #tpu.pipeline_mode<synchronous>, transform_indices = @transform_15, window_bounds = array<i64: 2, 64, 32>}, {pipeline_mode = #tpu.pipeline_mode<synchronous>, transform_indices = @transform_16, window_bounds = array<i64: 1, 32>}, {transform_indices = @transform_17, window_bounds = array<i64: 1, 8, 32>}]} {
    %c0 = arith.constant 0 : index
    %c0_0 = arith.constant 0 : index
    %0 = vector.load %arg3[%c0, %c0_0] : memref<1x32xf32, #tpu.memory_space<vmem>>, vector<1x32xf32>
    %c0_1 = arith.constant 0 : index
    %c0_2 = arith.constant 0 : index
    %1 = vector.load %arg4[%c0_1, %c0_2] : memref<1x32xf32, #tpu.memory_space<vmem>>, vector<1x32xf32>
    %c0_i32 = arith.constant 0 : i32
    %2 = arith.cmpi eq, %arg1, %c0_i32 : i32
    %3 = arith.extui %2 : i1 to i32
    %c0_i32_3 = arith.constant 0 : i32
    %4 = arith.cmpi ne, %3, %c0_i32_3 : i32
    scf.if %4 {
      %c0_i32_86 = arith.constant 0 : i32
      %c2_i32_87 = arith.constant 2 : i32
      %141 = arith.addi %c0_i32_86, %c2_i32_87 : i32
      %c1_i32_88 = arith.constant 1 : i32
      scf.for %arg25 = %c0_i32_86 to %141 step %c1_i32_88  : i32 {
        %c8_i32_90 = arith.constant 8 : i32
        %142 = arith.muli %arg25, %c8_i32_90 : i32
        %143 = tpu.assume_multiple %142, 8 : i32
        %c0_91 = arith.constant 0 : index
        %144 = arith.index_cast %143 : i32 to index
        %c0_92 = arith.constant 0 : index
        %145 = vector.load %arg2[%c0_91, %144, %c0_92] : memref<1x16x32xf32, #tpu.memory_space<vmem>>, vector<1x8x32xf32>
        %146 = vector.shape_cast %145 : vector<1x8x32xf32> to vector<8x32xf32>
        %cst_93 = arith.constant dense<0.000000e+00> : vector<8xf32>
        %147 = vector.multi_reduction <add>, %146, %cst_93 [1] : vector<8x32xf32> to vector<8xf32>
        %148 = vector.shape_cast %147 : vector<8xf32> to vector<8x1xf32>
        %cst_94 = arith.constant 3.200000e+01 : f32
        %149 = vector.broadcast %cst_94 : f32 to vector<8x1xf32>
        %150 = arith.divf %148, %149 : vector<8x1xf32>
        %151 = vector.broadcast %150 : vector<8x1xf32> to vector<8x32xf32>
        %152 = arith.subf %146, %151 : vector<8x32xf32>
        %153 = arith.mulf %152, %152 : vector<8x32xf32>
        %cst_95 = arith.constant dense<0.000000e+00> : vector<8xf32>
        %154 = vector.multi_reduction <add>, %153, %cst_95 [1] : vector<8x32xf32> to vector<8xf32>
        %155 = vector.shape_cast %154 : vector<8xf32> to vector<8x1xf32>
        %cst_96 = arith.constant 3.200000e+01 : f32
        %156 = vector.broadcast %cst_96 : f32 to vector<8x1xf32>
        %157 = arith.divf %155, %156 : vector<8x1xf32>
        %158 = vector.broadcast %150 : vector<8x1xf32> to vector<8x32xf32>
        %159 = arith.subf %146, %158 : vector<8x32xf32>
        %cst_97 = arith.constant 9.99999974E-6 : f32
        %160 = vector.broadcast %cst_97 : f32 to vector<8x1xf32>
        %161 = arith.addf %157, %160 : vector<8x1xf32>
        %162 = math.rsqrt %161 : vector<8x1xf32>
        %163 = vector.broadcast %162 : vector<8x1xf32> to vector<8x32xf32>
        %164 = arith.mulf %159, %163 : vector<8x32xf32>
        %165 = vector.broadcast %0 : vector<1x32xf32> to vector<8x32xf32>
        %166 = arith.mulf %164, %165 : vector<8x32xf32>
        %167 = vector.broadcast %1 : vector<1x32xf32> to vector<8x32xf32>
        %168 = arith.addf %166, %167 : vector<8x32xf32>
        %169 = arith.truncf %168 : vector<8x32xf32> to vector<8x32xbf16>
        %c0_98 = arith.constant 0 : index
        %c0_99 = arith.constant 0 : index
        %170 = vector.load %arg7[%c0_98, %c0_99] : memref<32x32xbf16, #tpu.memory_space<vmem>>, vector<32x32xbf16>
        %cst_100 = arith.constant dense<0.000000e+00> : vector<8x32xf32>
        %171 = tpu.matmul %169, %170, %cst_100 {dimension_numbers = #tpu.dot_dimension_numbers<[1], [0], [0], [1], [0, 0, 1, 1], [], []>} : vector<8x32xbf16>, vector<32x32xbf16>, vector<8x32xf32> -> vector<8x32xf32>
        %c0_101 = arith.constant 0 : index
        %c0_102 = arith.constant 0 : index
        %172 = vector.load %arg8[%c0_101, %c0_102] : memref<1x32xf32, #tpu.memory_space<vmem>>, vector<1x32xf32>
        %173 = vector.broadcast %172 : vector<1x32xf32> to vector<8x32xf32>
        %174 = arith.addf %171, %173 : vector<8x32xf32>
        %175 = arith.truncf %174 : vector<8x32xf32> to vector<8x32xbf16>
        %176 = arith.index_cast %143 : i32 to index
        %c0_103 = arith.constant 0 : index
        %177 = vector.load %arg20[%176, %c0_103] : memref<16x32xbf16, #tpu.memory_space<vmem>>, vector<8x32xbf16>
        tpu.vector_store %arg20[%176, %c0_103], %175 {strides = array<i32>} : memref<16x32xbf16, #tpu.memory_space<vmem>>, vector<8x32xbf16>,
        %c0_104 = arith.constant 0 : index
        %c0_105 = arith.constant 0 : index
        %178 = vector.load %arg9[%c0_104, %c0_105] : memref<32x32xbf16, #tpu.memory_space<vmem>>, vector<32x32xbf16>
        %cst_106 = arith.constant dense<0.000000e+00> : vector<8x32xf32>
        %179 = tpu.matmul %169, %178, %cst_106 {dimension_numbers = #tpu.dot_dimension_numbers<[1], [0], [0], [1], [0, 0, 1, 1], [], []>} : vector<8x32xbf16>, vector<32x32xbf16>, vector<8x32xf32> -> vector<8x32xf32>
        %c0_107 = arith.constant 0 : index
        %c0_108 = arith.constant 0 : index
        %180 = vector.load %arg10[%c0_107, %c0_108] : memref<1x32xf32, #tpu.memory_space<vmem>>, vector<1x32xf32>
        %181 = vector.broadcast %180 : vector<1x32xf32> to vector<8x32xf32>
        %182 = arith.addf %179, %181 : vector<8x32xf32>
        %183 = arith.truncf %182 : vector<8x32xf32> to vector<8x32xbf16>
        %184 = arith.index_cast %143 : i32 to index
        %c0_109 = arith.constant 0 : index
        %185 = vector.load %arg21[%184, %c0_109] : memref<16x32xbf16, #tpu.memory_space<vmem>>, vector<8x32xbf16>
        tpu.vector_store %arg21[%184, %c0_109], %183 {strides = array<i32>} : memref<16x32xbf16, #tpu.memory_space<vmem>>, vector<8x32xbf16>,
      }
      %c2_i32_89 = arith.constant 2 : i32
    } else {
    }
    %c8_i32 = arith.constant 8 : i32
    %5 = arith.muli %arg1, %c8_i32 : i32
    %6 = tpu.assume_multiple %5, 8 : i32
    %c0_4 = arith.constant 0 : index
    %7 = arith.index_cast %6 : i32 to index
    %c0_5 = arith.constant 0 : index
    %8 = vector.load %arg2[%c0_4, %7, %c0_5] : memref<1x16x32xf32, #tpu.memory_space<vmem>>, vector<1x8x32xf32>
    %9 = vector.shape_cast %8 : vector<1x8x32xf32> to vector<8x32xf32>
    %cst = arith.constant dense<0.000000e+00> : vector<8xf32>
    %10 = vector.multi_reduction <add>, %9, %cst [1] : vector<8x32xf32> to vector<8xf32>
    %11 = vector.shape_cast %10 : vector<8xf32> to vector<8x1xf32>
    %cst_6 = arith.constant 3.200000e+01 : f32
    %12 = vector.broadcast %cst_6 : f32 to vector<8x1xf32>
    %13 = arith.divf %11, %12 : vector<8x1xf32>
    %14 = vector.broadcast %13 : vector<8x1xf32> to vector<8x32xf32>
    %15 = arith.subf %9, %14 : vector<8x32xf32>
    %16 = arith.mulf %15, %15 : vector<8x32xf32>
    %cst_7 = arith.constant dense<0.000000e+00> : vector<8xf32>
    %17 = vector.multi_reduction <add>, %16, %cst_7 [1] : vector<8x32xf32> to vector<8xf32>
    %18 = vector.shape_cast %17 : vector<8xf32> to vector<8x1xf32>
    %cst_8 = arith.constant 3.200000e+01 : f32
    %19 = vector.broadcast %cst_8 : f32 to vector<8x1xf32>
    %20 = arith.divf %18, %19 : vector<8x1xf32>
    %21 = vector.broadcast %13 : vector<8x1xf32> to vector<8x32xf32>
    %22 = arith.subf %9, %21 : vector<8x32xf32>
    %cst_9 = arith.constant 9.99999974E-6 : f32
    %23 = vector.broadcast %cst_9 : f32 to vector<8x1xf32>
    %24 = arith.addf %20, %23 : vector<8x1xf32>
    %25 = math.rsqrt %24 : vector<8x1xf32>
    %26 = vector.broadcast %25 : vector<8x1xf32> to vector<8x32xf32>
    %27 = arith.mulf %22, %26 : vector<8x32xf32>
    %28 = vector.broadcast %0 : vector<1x32xf32> to vector<8x32xf32>
    %29 = arith.mulf %27, %28 : vector<8x32xf32>
    %30 = vector.broadcast %1 : vector<1x32xf32> to vector<8x32xf32>
    %31 = arith.addf %29, %30 : vector<8x32xf32>
    %32 = arith.truncf %31 : vector<8x32xf32> to vector<8x32xbf16>
    %c0_10 = arith.constant 0 : index
    %c0_11 = arith.constant 0 : index
    %33 = vector.load %arg5[%c0_10, %c0_11] : memref<32x32xbf16, #tpu.memory_space<vmem>>, vector<32x32xbf16>
    %cst_12 = arith.constant dense<0.000000e+00> : vector<8x32xf32>
    %34 = tpu.matmul %32, %33, %cst_12 {dimension_numbers = #tpu.dot_dimension_numbers<[1], [0], [0], [1], [0, 0, 1, 1], [], []>} : vector<8x32xbf16>, vector<32x32xbf16>, vector<8x32xf32> -> vector<8x32xf32>
    %c0_13 = arith.constant 0 : index
    %c0_14 = arith.constant 0 : index
    %35 = vector.load %arg6[%c0_13, %c0_14] : memref<1x32xf32, #tpu.memory_space<vmem>>, vector<1x32xf32>
    %36 = vector.broadcast %35 : vector<1x32xf32> to vector<8x32xf32>
    %37 = arith.addf %34, %36 : vector<8x32xf32>
    %cst_15 = arith.constant 0.353553385 : f32
    %38 = vector.broadcast %cst_15 : f32 to vector<8x32xf32>
    %39 = arith.mulf %37, %38 : vector<8x32xf32>
    %40 = arith.truncf %39 : vector<8x32xf32> to vector<8x32xbf16>
    %c0_16 = arith.constant 0 : index
    %c0_17 = arith.constant 0 : index
    %41 = vector.load %arg22[%c0_16, %c0_17] : memref<8x32xbf16, #tpu.memory_space<vmem>>, vector<8x32xbf16>
    tpu.vector_store %arg22[%c0_16, %c0_17], %40 {strides = array<i32>} : memref<8x32xbf16, #tpu.memory_space<vmem>>, vector<8x32xbf16>,
    %42 = tpu.iota {dimensions = array<i32: 0>} : vector<8x8xi32>
    %43 = tpu.iota {dimensions = array<i32: 1>} : vector<8x8xi32>
    %c0_18 = arith.constant 0 : index
    %c0_19 = arith.constant 0 : index
    %44 = vector.load %arg22[%c0_18, %c0_19] : memref<8x32xbf16, #tpu.memory_space<vmem>>, vector<8x8xbf16>
    %cst_20 = arith.constant -1.000000e+30 : f32
    %45 = vector.broadcast %cst_20 : f32 to vector<8x1xf32>
    %cst_21 = arith.constant 0.000000e+00 : f32
    %46 = vector.broadcast %cst_21 : f32 to vector<8x1xf32>
    %cst_22 = arith.constant 0.000000e+00 : f32
    %47 = vector.broadcast %cst_22 : f32 to vector<8x8xf32>
    %c1_i32 = arith.constant 1 : i32
    %48 = arith.addi %arg1, %c1_i32 : i32
    %c0_i32_23 = arith.constant 0 : i32
    %49 = arith.subi %48, %c0_i32_23 : i32
    %50 = arith.addi %c0_i32_23, %49 : i32
    %c1_i32_24 = arith.constant 1 : i32
    %51:3 = scf.for %arg25 = %c0_i32_23 to %50 step %c1_i32_24 iter_args(%arg26 = %45, %arg27 = %46, %arg28 = %47) -> (vector<8x1xf32>, vector<8x1xf32>, vector<8x8xf32>)  : i32 {
      %c8_i32_86 = arith.constant 8 : i32
      %141 = arith.muli %arg25, %c8_i32_86 : i32
      %142 = tpu.assume_multiple %141, 8 : i32
      %143 = arith.index_cast %142 : i32 to index
      %c0_87 = arith.constant 0 : index
      %144 = vector.load %arg20[%143, %c0_87] : memref<16x32xbf16, #tpu.memory_space<vmem>>, vector<8x8xbf16>
      %145 = arith.index_cast %142 : i32 to index
      %c0_88 = arith.constant 0 : index
      %146 = vector.load %arg21[%145, %c0_88] : memref<16x32xbf16, #tpu.memory_space<vmem>>, vector<8x8xbf16>
      %147 = tpu.transpose %144, [1, 0] : vector<8x8xbf16> -> vector<8x8xbf16>
      %cst_89 = arith.constant dense<0.000000e+00> : vector<8x8xf32>
      %148 = tpu.matmul %44, %147, %cst_89 {dimension_numbers = #tpu.dot_dimension_numbers<[1], [0], [0], [1], [0, 0, 1, 1], [], []>} : vector<8x8xbf16>, vector<8x8xbf16>, vector<8x8xf32> -> vector<8x8xf32>
      %149 = arith.cmpi eq, %arg25, %arg1 : i32
      %150 = arith.cmpi sgt, %43, %42 : vector<8x8xi32>
      %151 = vector.broadcast %149 : i1 to vector<8x8xi1>
      %152 = arith.andi %151, %150 : vector<8x8xi1>
      %cst_90 = arith.constant -1.000000e+04 : f32
      %153 = vector.broadcast %cst_90 : f32 to vector<8x8xf32>
      %154 = arith.select %152, %153, %148 : vector<8x8xi1>, vector<8x8xf32>
      %cst_91 = arith.constant dense<0xFF800000> : vector<8xf32>
      %155 = vector.multi_reduction <maximumf>, %154, %cst_91 [1] : vector<8x8xf32> to vector<8xf32>
      %156 = vector.shape_cast %155 : vector<8xf32> to vector<8x1xf32>
      %157 = arith.maximumf %arg26, %156 : vector<8x1xf32>
      %158 = arith.subf %arg26, %157 : vector<8x1xf32>
      %159 = math.exp %158 : vector<8x1xf32>
      %160 = vector.broadcast %157 : vector<8x1xf32> to vector<8x8xf32>
      %161 = arith.subf %154, %160 : vector<8x8xf32>
      %162 = math.exp %161 : vector<8x8xf32>
      %163 = arith.mulf %159, %arg27 : vector<8x1xf32>
      %cst_92 = arith.constant dense<0.000000e+00> : vector<8xf32>
      %164 = vector.multi_reduction <add>, %162, %cst_92 [1] : vector<8x8xf32> to vector<8xf32>
      %165 = vector.shape_cast %164 : vector<8xf32> to vector<8x1xf32>
      %166 = arith.addf %163, %165 : vector<8x1xf32>
      %167 = vector.broadcast %159 : vector<8x1xf32> to vector<8x8xf32>
      %168 = arith.mulf %167, %arg28 : vector<8x8xf32>
      %169 = arith.truncf %162 : vector<8x8xf32> to vector<8x8xbf16>
      %cst_93 = arith.constant dense<0.000000e+00> : vector<8x8xf32>
      %170 = tpu.matmul %169, %146, %cst_93 {dimension_numbers = #tpu.dot_dimension_numbers<[1], [0], [0], [1], [0, 0, 1, 1], [], []>} : vector<8x8xbf16>, vector<8x8xbf16>, vector<8x8xf32> -> vector<8x8xf32>
      %171 = arith.addf %168, %170 : vector<8x8xf32>
      scf.yield %157, %166, %171 : vector<8x1xf32>, vector<8x1xf32>, vector<8x8xf32>
    }
    %52 = tpu.reciprocal %51#1 {approx = true} : vector<8x1xf32> -> vector<8x1xf32>
    %53 = vector.broadcast %52 : vector<8x1xf32> to vector<8x8xf32>
    %54 = arith.mulf %51#2, %53 : vector<8x8xf32>
    %55 = arith.truncf %54 : vector<8x8xf32> to vector<8x8xbf16>
    %c0_25 = arith.constant 0 : index
    %c0_26 = arith.constant 0 : index
    %56 = vector.load %arg23[%c0_25, %c0_26] : memref<8x32xbf16, #tpu.memory_space<vmem>>, vector<8x8xbf16>
    tpu.vector_store %arg23[%c0_25, %c0_26], %55 {strides = array<i32>} : memref<8x32xbf16, #tpu.memory_space<vmem>>, vector<8x8xbf16>,
    %c0_27 = arith.constant 0 : index
    %c8 = arith.constant 8 : index
    %57 = vector.load %arg22[%c0_27, %c8] : memref<8x32xbf16, #tpu.memory_space<vmem>>, vector<8x8xbf16>
    %cst_28 = arith.constant -1.000000e+30 : f32
    %58 = vector.broadcast %cst_28 : f32 to vector<8x1xf32>
    %cst_29 = arith.constant 0.000000e+00 : f32
    %59 = vector.broadcast %cst_29 : f32 to vector<8x1xf32>
    %cst_30 = arith.constant 0.000000e+00 : f32
    %60 = vector.broadcast %cst_30 : f32 to vector<8x8xf32>
    %c1_i32_31 = arith.constant 1 : i32
    %61 = arith.addi %arg1, %c1_i32_31 : i32
    %c0_i32_32 = arith.constant 0 : i32
    %62 = arith.subi %61, %c0_i32_32 : i32
    %63 = arith.addi %c0_i32_32, %62 : i32
    %c1_i32_33 = arith.constant 1 : i32
    %64:3 = scf.for %arg25 = %c0_i32_32 to %63 step %c1_i32_33 iter_args(%arg26 = %58, %arg27 = %59, %arg28 = %60) -> (vector<8x1xf32>, vector<8x1xf32>, vector<8x8xf32>)  : i32 {
      %c8_i32_86 = arith.constant 8 : i32
      %141 = arith.muli %arg25, %c8_i32_86 : i32
      %142 = tpu.assume_multiple %141, 8 : i32
      %143 = arith.index_cast %142 : i32 to index
      %c8_87 = arith.constant 8 : index
      %144 = vector.load %arg20[%143, %c8_87] : memref<16x32xbf16, #tpu.memory_space<vmem>>, vector<8x8xbf16>
      %145 = arith.index_cast %142 : i32 to index
      %c8_88 = arith.constant 8 : index
      %146 = vector.load %arg21[%145, %c8_88] : memref<16x32xbf16, #tpu.memory_space<vmem>>, vector<8x8xbf16>
      %147 = tpu.transpose %144, [1, 0] : vector<8x8xbf16> -> vector<8x8xbf16>
      %cst_89 = arith.constant dense<0.000000e+00> : vector<8x8xf32>
      %148 = tpu.matmul %57, %147, %cst_89 {dimension_numbers = #tpu.dot_dimension_numbers<[1], [0], [0], [1], [0, 0, 1, 1], [], []>} : vector<8x8xbf16>, vector<8x8xbf16>, vector<8x8xf32> -> vector<8x8xf32>
      %149 = arith.cmpi eq, %arg25, %arg1 : i32
      %150 = arith.cmpi sgt, %43, %42 : vector<8x8xi32>
      %151 = vector.broadcast %149 : i1 to vector<8x8xi1>
      %152 = arith.andi %151, %150 : vector<8x8xi1>
      %cst_90 = arith.constant -1.000000e+04 : f32
      %153 = vector.broadcast %cst_90 : f32 to vector<8x8xf32>
      %154 = arith.select %152, %153, %148 : vector<8x8xi1>, vector<8x8xf32>
      %cst_91 = arith.constant dense<0xFF800000> : vector<8xf32>
      %155 = vector.multi_reduction <maximumf>, %154, %cst_91 [1] : vector<8x8xf32> to vector<8xf32>
      %156 = vector.shape_cast %155 : vector<8xf32> to vector<8x1xf32>
      %157 = arith.maximumf %arg26, %156 : vector<8x1xf32>
      %158 = arith.subf %arg26, %157 : vector<8x1xf32>
      %159 = math.exp %158 : vector<8x1xf32>
      %160 = vector.broadcast %157 : vector<8x1xf32> to vector<8x8xf32>
      %161 = arith.subf %154, %160 : vector<8x8xf32>
      %162 = math.exp %161 : vector<8x8xf32>
      %163 = arith.mulf %159, %arg27 : vector<8x1xf32>
      %cst_92 = arith.constant dense<0.000000e+00> : vector<8xf32>
      %164 = vector.multi_reduction <add>, %162, %cst_92 [1] : vector<8x8xf32> to vector<8xf32>
      %165 = vector.shape_cast %164 : vector<8xf32> to vector<8x1xf32>
      %166 = arith.addf %163, %165 : vector<8x1xf32>
      %167 = vector.broadcast %159 : vector<8x1xf32> to vector<8x8xf32>
      %168 = arith.mulf %167, %arg28 : vector<8x8xf32>
      %169 = arith.truncf %162 : vector<8x8xf32> to vector<8x8xbf16>
      %cst_93 = arith.constant dense<0.000000e+00> : vector<8x8xf32>
      %170 = tpu.matmul %169, %146, %cst_93 {dimension_numbers = #tpu.dot_dimension_numbers<[1], [0], [0], [1], [0, 0, 1, 1], [], []>} : vector<8x8xbf16>, vector<8x8xbf16>, vector<8x8xf32> -> vector<8x8xf32>
      %171 = arith.addf %168, %170 : vector<8x8xf32>
      scf.yield %157, %166, %171 : vector<8x1xf32>, vector<8x1xf32>, vector<8x8xf32>
    }
    %65 = tpu.reciprocal %64#1 {approx = true} : vector<8x1xf32> -> vector<8x1xf32>
    %66 = vector.broadcast %65 : vector<8x1xf32> to vector<8x8xf32>
    %67 = arith.mulf %64#2, %66 : vector<8x8xf32>
    %68 = arith.truncf %67 : vector<8x8xf32> to vector<8x8xbf16>
    %c0_34 = arith.constant 0 : index
    %c8_35 = arith.constant 8 : index
    %69 = vector.load %arg23[%c0_34, %c8_35] : memref<8x32xbf16, #tpu.memory_space<vmem>>, vector<8x8xbf16>
    tpu.vector_store %arg23[%c0_34, %c8_35], %68 {strides = array<i32>} : memref<8x32xbf16, #tpu.memory_space<vmem>>, vector<8x8xbf16>,
    %c0_36 = arith.constant 0 : index
    %c16 = arith.constant 16 : index
    %70 = vector.load %arg22[%c0_36, %c16] : memref<8x32xbf16, #tpu.memory_space<vmem>>, vector<8x8xbf16>
    %cst_37 = arith.constant -1.000000e+30 : f32
    %71 = vector.broadcast %cst_37 : f32 to vector<8x1xf32>
    %cst_38 = arith.constant 0.000000e+00 : f32
    %72 = vector.broadcast %cst_38 : f32 to vector<8x1xf32>
    %cst_39 = arith.constant 0.000000e+00 : f32
    %73 = vector.broadcast %cst_39 : f32 to vector<8x8xf32>
    %c1_i32_40 = arith.constant 1 : i32
    %74 = arith.addi %arg1, %c1_i32_40 : i32
    %c0_i32_41 = arith.constant 0 : i32
    %75 = arith.subi %74, %c0_i32_41 : i32
    %76 = arith.addi %c0_i32_41, %75 : i32
    %c1_i32_42 = arith.constant 1 : i32
    %77:3 = scf.for %arg25 = %c0_i32_41 to %76 step %c1_i32_42 iter_args(%arg26 = %71, %arg27 = %72, %arg28 = %73) -> (vector<8x1xf32>, vector<8x1xf32>, vector<8x8xf32>)  : i32 {
      %c8_i32_86 = arith.constant 8 : i32
      %141 = arith.muli %arg25, %c8_i32_86 : i32
      %142 = tpu.assume_multiple %141, 8 : i32
      %143 = arith.index_cast %142 : i32 to index
      %c16_87 = arith.constant 16 : index
      %144 = vector.load %arg20[%143, %c16_87] : memref<16x32xbf16, #tpu.memory_space<vmem>>, vector<8x8xbf16>
      %145 = arith.index_cast %142 : i32 to index
      %c16_88 = arith.constant 16 : index
      %146 = vector.load %arg21[%145, %c16_88] : memref<16x32xbf16, #tpu.memory_space<vmem>>, vector<8x8xbf16>
      %147 = tpu.transpose %144, [1, 0] : vector<8x8xbf16> -> vector<8x8xbf16>
      %cst_89 = arith.constant dense<0.000000e+00> : vector<8x8xf32>
      %148 = tpu.matmul %70, %147, %cst_89 {dimension_numbers = #tpu.dot_dimension_numbers<[1], [0], [0], [1], [0, 0, 1, 1], [], []>} : vector<8x8xbf16>, vector<8x8xbf16>, vector<8x8xf32> -> vector<8x8xf32>
      %149 = arith.cmpi eq, %arg25, %arg1 : i32
      %150 = arith.cmpi sgt, %43, %42 : vector<8x8xi32>
      %151 = vector.broadcast %149 : i1 to vector<8x8xi1>
      %152 = arith.andi %151, %150 : vector<8x8xi1>
      %cst_90 = arith.constant -1.000000e+04 : f32
      %153 = vector.broadcast %cst_90 : f32 to vector<8x8xf32>
      %154 = arith.select %152, %153, %148 : vector<8x8xi1>, vector<8x8xf32>
      %cst_91 = arith.constant dense<0xFF800000> : vector<8xf32>
      %155 = vector.multi_reduction <maximumf>, %154, %cst_91 [1] : vector<8x8xf32> to vector<8xf32>
      %156 = vector.shape_cast %155 : vector<8xf32> to vector<8x1xf32>
      %157 = arith.maximumf %arg26, %156 : vector<8x1xf32>
      %158 = arith.subf %arg26, %157 : vector<8x1xf32>
      %159 = math.exp %158 : vector<8x1xf32>
      %160 = vector.broadcast %157 : vector<8x1xf32> to vector<8x8xf32>
      %161 = arith.subf %154, %160 : vector<8x8xf32>
      %162 = math.exp %161 : vector<8x8xf32>
      %163 = arith.mulf %159, %arg27 : vector<8x1xf32>
      %cst_92 = arith.constant dense<0.000000e+00> : vector<8xf32>
      %164 = vector.multi_reduction <add>, %162, %cst_92 [1] : vector<8x8xf32> to vector<8xf32>
      %165 = vector.shape_cast %164 : vector<8xf32> to vector<8x1xf32>
      %166 = arith.addf %163, %165 : vector<8x1xf32>
      %167 = vector.broadcast %159 : vector<8x1xf32> to vector<8x8xf32>
      %168 = arith.mulf %167, %arg28 : vector<8x8xf32>
      %169 = arith.truncf %162 : vector<8x8xf32> to vector<8x8xbf16>
      %cst_93 = arith.constant dense<0.000000e+00> : vector<8x8xf32>
      %170 = tpu.matmul %169, %146, %cst_93 {dimension_numbers = #tpu.dot_dimension_numbers<[1], [0], [0], [1], [0, 0, 1, 1], [], []>} : vector<8x8xbf16>, vector<8x8xbf16>, vector<8x8xf32> -> vector<8x8xf32>
      %171 = arith.addf %168, %170 : vector<8x8xf32>
      scf.yield %157, %166, %171 : vector<8x1xf32>, vector<8x1xf32>, vector<8x8xf32>
    }
    %78 = tpu.reciprocal %77#1 {approx = true} : vector<8x1xf32> -> vector<8x1xf32>
    %79 = vector.broadcast %78 : vector<8x1xf32> to vector<8x8xf32>
    %80 = arith.mulf %77#2, %79 : vector<8x8xf32>
    %81 = arith.truncf %80 : vector<8x8xf32> to vector<8x8xbf16>
    %c0_43 = arith.constant 0 : index
    %c16_44 = arith.constant 16 : index
    %82 = vector.load %arg23[%c0_43, %c16_44] : memref<8x32xbf16, #tpu.memory_space<vmem>>, vector<8x8xbf16>
    tpu.vector_store %arg23[%c0_43, %c16_44], %81 {strides = array<i32>} : memref<8x32xbf16, #tpu.memory_space<vmem>>, vector<8x8xbf16>,
    %c0_45 = arith.constant 0 : index
    %c24 = arith.constant 24 : index
    %83 = vector.load %arg22[%c0_45, %c24] : memref<8x32xbf16, #tpu.memory_space<vmem>>, vector<8x8xbf16>
    %cst_46 = arith.constant -1.000000e+30 : f32
    %84 = vector.broadcast %cst_46 : f32 to vector<8x1xf32>
    %cst_47 = arith.constant 0.000000e+00 : f32
    %85 = vector.broadcast %cst_47 : f32 to vector<8x1xf32>
    %cst_48 = arith.constant 0.000000e+00 : f32
    %86 = vector.broadcast %cst_48 : f32 to vector<8x8xf32>
    %c1_i32_49 = arith.constant 1 : i32
    %87 = arith.addi %arg1, %c1_i32_49 : i32
    %c0_i32_50 = arith.constant 0 : i32
    %88 = arith.subi %87, %c0_i32_50 : i32
    %89 = arith.addi %c0_i32_50, %88 : i32
    %c1_i32_51 = arith.constant 1 : i32
    %90:3 = scf.for %arg25 = %c0_i32_50 to %89 step %c1_i32_51 iter_args(%arg26 = %84, %arg27 = %85, %arg28 = %86) -> (vector<8x1xf32>, vector<8x1xf32>, vector<8x8xf32>)  : i32 {
      %c8_i32_86 = arith.constant 8 : i32
      %141 = arith.muli %arg25, %c8_i32_86 : i32
      %142 = tpu.assume_multiple %141, 8 : i32
      %143 = arith.index_cast %142 : i32 to index
      %c24_87 = arith.constant 24 : index
      %144 = vector.load %arg20[%143, %c24_87] : memref<16x32xbf16, #tpu.memory_space<vmem>>, vector<8x8xbf16>
      %145 = arith.index_cast %142 : i32 to index
      %c24_88 = arith.constant 24 : index
      %146 = vector.load %arg21[%145, %c24_88] : memref<16x32xbf16, #tpu.memory_space<vmem>>, vector<8x8xbf16>
      %147 = tpu.transpose %144, [1, 0] : vector<8x8xbf16> -> vector<8x8xbf16>
      %cst_89 = arith.constant dense<0.000000e+00> : vector<8x8xf32>
      %148 = tpu.matmul %83, %147, %cst_89 {dimension_numbers = #tpu.dot_dimension_numbers<[1], [0], [0], [1], [0, 0, 1, 1], [], []>} : vector<8x8xbf16>, vector<8x8xbf16>, vector<8x8xf32> -> vector<8x8xf32>
      %149 = arith.cmpi eq, %arg25, %arg1 : i32
      %150 = arith.cmpi sgt, %43, %42 : vector<8x8xi32>
      %151 = vector.broadcast %149 : i1 to vector<8x8xi1>
      %152 = arith.andi %151, %150 : vector<8x8xi1>
      %cst_90 = arith.constant -1.000000e+04 : f32
      %153 = vector.broadcast %cst_90 : f32 to vector<8x8xf32>
      %154 = arith.select %152, %153, %148 : vector<8x8xi1>, vector<8x8xf32>
      %cst_91 = arith.constant dense<0xFF800000> : vector<8xf32>
      %155 = vector.multi_reduction <maximumf>, %154, %cst_91 [1] : vector<8x8xf32> to vector<8xf32>
      %156 = vector.shape_cast %155 : vector<8xf32> to vector<8x1xf32>
      %157 = arith.maximumf %arg26, %156 : vector<8x1xf32>
      %158 = arith.subf %arg26, %157 : vector<8x1xf32>
      %159 = math.exp %158 : vector<8x1xf32>
      %160 = vector.broadcast %157 : vector<8x1xf32> to vector<8x8xf32>
      %161 = arith.subf %154, %160 : vector<8x8xf32>
      %162 = math.exp %161 : vector<8x8xf32>
      %163 = arith.mulf %159, %arg27 : vector<8x1xf32>
      %cst_92 = arith.constant dense<0.000000e+00> : vector<8xf32>
      %164 = vector.multi_reduction <add>, %162, %cst_92 [1] : vector<8x8xf32> to vector<8xf32>
      %165 = vector.shape_cast %164 : vector<8xf32> to vector<8x1xf32>
      %166 = arith.addf %163, %165 : vector<8x1xf32>
      %167 = vector.broadcast %159 : vector<8x1xf32> to vector<8x8xf32>
      %168 = arith.mulf %167, %arg28 : vector<8x8xf32>
      %169 = arith.truncf %162 : vector<8x8xf32> to vector<8x8xbf16>
      %cst_93 = arith.constant dense<0.000000e+00> : vector<8x8xf32>
      %170 = tpu.matmul %169, %146, %cst_93 {dimension_numbers = #tpu.dot_dimension_numbers<[1], [0], [0], [1], [0, 0, 1, 1], [], []>} : vector<8x8xbf16>, vector<8x8xbf16>, vector<8x8xf32> -> vector<8x8xf32>
      %171 = arith.addf %168, %170 : vector<8x8xf32>
      scf.yield %157, %166, %171 : vector<8x1xf32>, vector<8x1xf32>, vector<8x8xf32>
    }
    %91 = tpu.reciprocal %90#1 {approx = true} : vector<8x1xf32> -> vector<8x1xf32>
    %92 = vector.broadcast %91 : vector<8x1xf32> to vector<8x8xf32>
    %93 = arith.mulf %90#2, %92 : vector<8x8xf32>
    %94 = arith.truncf %93 : vector<8x8xf32> to vector<8x8xbf16>
    %c0_52 = arith.constant 0 : index
    %c24_53 = arith.constant 24 : index
    %95 = vector.load %arg23[%c0_52, %c24_53] : memref<8x32xbf16, #tpu.memory_space<vmem>>, vector<8x8xbf16>
    tpu.vector_store %arg23[%c0_52, %c24_53], %94 {strides = array<i32>} : memref<8x32xbf16, #tpu.memory_space<vmem>>, vector<8x8xbf16>,
    %c0_54 = arith.constant 0 : index
    %c0_55 = arith.constant 0 : index
    %96 = vector.load %arg23[%c0_54, %c0_55] : memref<8x32xbf16, #tpu.memory_space<vmem>>, vector<8x32xbf16>
    %c0_56 = arith.constant 0 : index
    %c0_57 = arith.constant 0 : index
    %97 = vector.load %arg11[%c0_56, %c0_57] : memref<32x32xbf16, #tpu.memory_space<vmem>>, vector<32x32xbf16>
    %cst_58 = arith.constant dense<0.000000e+00> : vector<8x32xf32>
    %98 = tpu.matmul %96, %97, %cst_58 {dimension_numbers = #tpu.dot_dimension_numbers<[1], [0], [0], [1], [0, 0, 1, 1], [], []>} : vector<8x32xbf16>, vector<32x32xbf16>, vector<8x32xf32> -> vector<8x32xf32>
    %c0_59 = arith.constant 0 : index
    %c0_60 = arith.constant 0 : index
    %99 = vector.load %arg12[%c0_59, %c0_60] : memref<1x32xf32, #tpu.memory_space<vmem>>, vector<1x32xf32>
    %100 = vector.broadcast %99 : vector<1x32xf32> to vector<8x32xf32>
    %101 = arith.addf %98, %100 : vector<8x32xf32>
    %c0_61 = arith.constant 0 : index
    %102 = arith.index_cast %6 : i32 to index
    %c0_62 = arith.constant 0 : index
    %103 = vector.load %arg2[%c0_61, %102, %c0_62] : memref<1x16x32xf32, #tpu.memory_space<vmem>>, vector<1x8x32xf32>
    %104 = vector.shape_cast %103 : vector<1x8x32xf32> to vector<8x32xf32>
    %105 = arith.addf %101, %104 : vector<8x32xf32>
    %c0_63 = arith.constant 0 : index
    %c0_64 = arith.constant 0 : index
    %106 = vector.load %arg13[%c0_63, %c0_64] : memref<1x32xf32, #tpu.memory_space<vmem>>, vector<1x32xf32>
    %c0_65 = arith.constant 0 : index
    %c0_66 = arith.constant 0 : index
    %107 = vector.load %arg14[%c0_65, %c0_66] : memref<1x32xf32, #tpu.memory_space<vmem>>, vector<1x32xf32>
    %cst_67 = arith.constant dense<0.000000e+00> : vector<8xf32>
    %108 = vector.multi_reduction <add>, %105, %cst_67 [1] : vector<8x32xf32> to vector<8xf32>
    %109 = vector.shape_cast %108 : vector<8xf32> to vector<8x1xf32>
    %cst_68 = arith.constant 3.200000e+01 : f32
    %110 = vector.broadcast %cst_68 : f32 to vector<8x1xf32>
    %111 = arith.divf %109, %110 : vector<8x1xf32>
    %112 = vector.broadcast %111 : vector<8x1xf32> to vector<8x32xf32>
    %113 = arith.subf %105, %112 : vector<8x32xf32>
    %114 = arith.mulf %113, %113 : vector<8x32xf32>
    %cst_69 = arith.constant dense<0.000000e+00> : vector<8xf32>
    %115 = vector.multi_reduction <add>, %114, %cst_69 [1] : vector<8x32xf32> to vector<8xf32>
    %116 = vector.shape_cast %115 : vector<8xf32> to vector<8x1xf32>
    %cst_70 = arith.constant 3.200000e+01 : f32
    %117 = vector.broadcast %cst_70 : f32 to vector<8x1xf32>
    %118 = arith.divf %116, %117 : vector<8x1xf32>
    %119 = vector.broadcast %111 : vector<8x1xf32> to vector<8x32xf32>
    %120 = arith.subf %105, %119 : vector<8x32xf32>
    %cst_71 = arith.constant 9.99999974E-6 : f32
    %121 = vector.broadcast %cst_71 : f32 to vector<8x1xf32>
    %122 = arith.addf %118, %121 : vector<8x1xf32>
    %123 = math.rsqrt %122 : vector<8x1xf32>
    %124 = vector.broadcast %123 : vector<8x1xf32> to vector<8x32xf32>
    %125 = arith.mulf %120, %124 : vector<8x32xf32>
    %126 = vector.broadcast %106 : vector<1x32xf32> to vector<8x32xf32>
    %127 = arith.mulf %125, %126 : vector<8x32xf32>
    %128 = vector.broadcast %107 : vector<1x32xf32> to vector<8x32xf32>
    %129 = arith.addf %127, %128 : vector<8x32xf32>
    %130 = arith.truncf %129 : vector<8x32xf32> to vector<8x32xbf16>
    %c0_72 = arith.constant 0 : index
    %c0_73 = arith.constant 0 : index
    %131 = vector.load %arg22[%c0_72, %c0_73] : memref<8x32xbf16, #tpu.memory_space<vmem>>, vector<8x32xbf16>
    tpu.vector_store %arg22[%c0_72, %c0_73], %130 {strides = array<i32>} : memref<8x32xbf16, #tpu.memory_space<vmem>>, vector<8x32xbf16>,
    %c0_74 = arith.constant 0 : index
    %c0_75 = arith.constant 0 : index
    %132 = vector.load %arg24[%c0_74, %c0_75] : memref<8x32xf32, #tpu.memory_space<vmem>>, vector<8x32xf32>
    tpu.vector_store %arg24[%c0_74, %c0_75], %105 {strides = array<i32>} : memref<8x32xf32, #tpu.memory_space<vmem>>, vector<8x32xf32>,
    %c0_i32_76 = arith.constant 0 : i32
    %c2_i32 = arith.constant 2 : i32
    %133 = arith.addi %c0_i32_76, %c2_i32 : i32
    %c1_i32_77 = arith.constant 1 : i32
    scf.for %arg25 = %c0_i32_76 to %133 step %c1_i32_77  : i32 {
      %c0_86 = arith.constant 0 : index
      %c0_87 = arith.constant 0 : index
      %141 = vector.load %arg22[%c0_86, %c0_87] : memref<8x32xbf16, #tpu.memory_space<vmem>>, vector<8x32xbf16>
      %142 = arith.index_cast %arg25 : i32 to index
      %c0_88 = arith.constant 0 : index
      %c0_89 = arith.constant 0 : index
      %143 = vector.load %arg15[%142, %c0_88, %c0_89] : memref<2x32x64xbf16, #tpu.memory_space<vmem>>, vector<1x32x64xbf16>
      %144 = vector.shape_cast %143 : vector<1x32x64xbf16> to vector<32x64xbf16>
      %cst_90 = arith.constant dense<0.000000e+00> : vector<8x64xf32>
      %145 = tpu.matmul %141, %144, %cst_90 {dimension_numbers = #tpu.dot_dimension_numbers<[1], [0], [0], [1], [0, 0, 1, 1], [], []>} : vector<8x32xbf16>, vector<32x64xbf16>, vector<8x64xf32> -> vector<8x64xf32>
      %146 = arith.index_cast %arg25 : i32 to index
      %c0_91 = arith.constant 0 : index
      %c0_92 = arith.constant 0 : index
      %147 = vector.load %arg16[%146, %c0_91, %c0_92] : memref<2x1x64xf32, #tpu.memory_space<vmem>>, vector<1x1x64xf32>
      %148 = vector.shape_cast %147 : vector<1x1x64xf32> to vector<1x64xf32>
      %149 = vector.broadcast %148 : vector<1x64xf32> to vector<8x64xf32>
      %150 = arith.addf %145, %149 : vector<8x64xf32>
      %cst_93 = arith.constant 5.000000e-01 : f32
      %151 = vector.broadcast %cst_93 : f32 to vector<8x64xf32>
      %152 = arith.mulf %151, %150 : vector<8x64xf32>
      %cst_94 = arith.constant 0.707106769 : f32
      %153 = vector.broadcast %cst_94 : f32 to vector<8x64xf32>
      %154 = arith.mulf %150, %153 : vector<8x64xf32>
      %155 = math.erf %154 : vector<8x64xf32>
      %cst_95 = arith.constant 1.000000e+00 : f32
      %156 = vector.broadcast %cst_95 : f32 to vector<8x64xf32>
      %157 = arith.addf %156, %155 : vector<8x64xf32>
      %158 = arith.mulf %152, %157 : vector<8x64xf32>
      %c0_96 = arith.constant 0 : index
      %c0_97 = arith.constant 0 : index
      %159 = vector.load %arg24[%c0_96, %c0_97] : memref<8x32xf32, #tpu.memory_space<vmem>>, vector<8x32xf32>
      %160 = arith.truncf %158 : vector<8x64xf32> to vector<8x64xbf16>
      %161 = arith.index_cast %arg25 : i32 to index
      %c0_98 = arith.constant 0 : index
      %c0_99 = arith.constant 0 : index
      %162 = vector.load %arg17[%161, %c0_98, %c0_99] : memref<2x64x32xbf16, #tpu.memory_space<vmem>>, vector<1x64x32xbf16>
      %163 = vector.shape_cast %162 : vector<1x64x32xbf16> to vector<64x32xbf16>
      %cst_100 = arith.constant dense<0.000000e+00> : vector<8x32xf32>
      %164 = tpu.matmul %160, %163, %cst_100 {dimension_numbers = #tpu.dot_dimension_numbers<[1], [0], [0], [1], [0, 0, 1, 1], [], []>} : vector<8x64xbf16>, vector<64x32xbf16>, vector<8x32xf32> -> vector<8x32xf32>
      %165 = arith.addf %159, %164 : vector<8x32xf32>
      %c0_101 = arith.constant 0 : index
      %c0_102 = arith.constant 0 : index
      %166 = vector.load %arg24[%c0_101, %c0_102] : memref<8x32xf32, #tpu.memory_space<vmem>>, vector<8x32xf32>
      tpu.vector_store %arg24[%c0_101, %c0_102], %165 {strides = array<i32>} : memref<8x32xf32, #tpu.memory_space<vmem>>, vector<8x32xf32>,
    }
    %c2_i32_78 = arith.constant 2 : i32
    %c0_79 = arith.constant 0 : index
    %c0_80 = arith.constant 0 : index
    %134 = vector.load %arg24[%c0_79, %c0_80] : memref<8x32xf32, #tpu.memory_space<vmem>>, vector<8x32xf32>
    %c0_81 = arith.constant 0 : index
    %c0_82 = arith.constant 0 : index
    %135 = vector.load %arg18[%c0_81, %c0_82] : memref<1x32xf32, #tpu.memory_space<vmem>>, vector<1x32xf32>
    %136 = vector.broadcast %135 : vector<1x32xf32> to vector<8x32xf32>
    %137 = arith.addf %134, %136 : vector<8x32xf32>
    %c0_83 = arith.constant 0 : index
    %c0_84 = arith.constant 0 : index
    %c0_85 = arith.constant 0 : index
    %138 = vector.load %arg19[%c0_83, %c0_84, %c0_85] : memref<1x8x32xf32, #tpu.memory_space<vmem>>, vector<1x8x32xf32>
    %139 = vector.shape_cast %138 : vector<1x8x32xf32> to vector<8x32xf32>
    %140 = vector.shape_cast %137 : vector<8x32xf32> to vector<1x8x32xf32>
    tpu.vector_store %arg19[%c0_83, %c0_84, %c0_85], %140 {strides = array<i32>} : memref<1x8x32xf32, #tpu.memory_space<vmem>>, vector<1x8x32xf32>,
    return
  }
  func.func @transform_0(%arg0: i32, %arg1: i32) -> (i32, i32, i32) {
    %c0_i32 = arith.constant 0 : i32
    %c0_i32_0 = arith.constant 0 : i32
    %c0_i32_1 = arith.constant 0 : i32
    return %arg0, %c0_i32, %c0_i32_0 : i32, i32, i32
  }
  func.func @transform_1(%arg0: i32, %arg1: i32) -> (i32, i32) {
    %c0_i32 = arith.constant 0 : i32
    %c0_i32_0 = arith.constant 0 : i32
    %c0_i32_1 = arith.constant 0 : i32
    return %c0_i32, %c0_i32_0 : i32, i32
  }
  func.func @transform_2(%arg0: i32, %arg1: i32) -> (i32, i32) {
    %c0_i32 = arith.constant 0 : i32
    %c0_i32_0 = arith.constant 0 : i32
    %c0_i32_1 = arith.constant 0 : i32
    return %c0_i32, %c0_i32_0 : i32, i32
  }
  func.func @transform_3(%arg0: i32, %arg1: i32) -> (i32, i32) {
    %c0_i32 = arith.constant 0 : i32
    %c0_i32_0 = arith.constant 0 : i32
    %c0_i32_1 = arith.constant 0 : i32
    return %c0_i32, %c0_i32_0 : i32, i32
  }
  func.func @transform_4(%arg0: i32, %arg1: i32) -> (i32, i32) {
    %c0_i32 = arith.constant 0 : i32
    %c0_i32_0 = arith.constant 0 : i32
    %c0_i32_1 = arith.constant 0 : i32
    return %c0_i32, %c0_i32_0 : i32, i32
  }
  func.func @transform_5(%arg0: i32, %arg1: i32) -> (i32, i32) {
    %c0_i32 = arith.constant 0 : i32
    %c0_i32_0 = arith.constant 0 : i32
    %c0_i32_1 = arith.constant 0 : i32
    return %c0_i32, %c0_i32_0 : i32, i32
  }
  func.func @transform_6(%arg0: i32, %arg1: i32) -> (i32, i32) {
    %c0_i32 = arith.constant 0 : i32
    %c0_i32_0 = arith.constant 0 : i32
    %c0_i32_1 = arith.constant 0 : i32
    return %c0_i32, %c0_i32_0 : i32, i32
  }
  func.func @transform_7(%arg0: i32, %arg1: i32) -> (i32, i32) {
    %c0_i32 = arith.constant 0 : i32
    %c0_i32_0 = arith.constant 0 : i32
    %c0_i32_1 = arith.constant 0 : i32
    return %c0_i32, %c0_i32_0 : i32, i32
  }
  func.func @transform_8(%arg0: i32, %arg1: i32) -> (i32, i32) {
    %c0_i32 = arith.constant 0 : i32
    %c0_i32_0 = arith.constant 0 : i32
    %c0_i32_1 = arith.constant 0 : i32
    return %c0_i32, %c0_i32_0 : i32, i32
  }
  func.func @transform_9(%arg0: i32, %arg1: i32) -> (i32, i32) {
    %c0_i32 = arith.constant 0 : i32
    %c0_i32_0 = arith.constant 0 : i32
    %c0_i32_1 = arith.constant 0 : i32
    return %c0_i32, %c0_i32_0 : i32, i32
  }
  func.func @transform_10(%arg0: i32, %arg1: i32) -> (i32, i32) {
    %c0_i32 = arith.constant 0 : i32
    %c0_i32_0 = arith.constant 0 : i32
    %c0_i32_1 = arith.constant 0 : i32
    return %c0_i32, %c0_i32_0 : i32, i32
  }
  func.func @transform_11(%arg0: i32, %arg1: i32) -> (i32, i32) {
    %c0_i32 = arith.constant 0 : i32
    %c0_i32_0 = arith.constant 0 : i32
    %c0_i32_1 = arith.constant 0 : i32
    return %c0_i32, %c0_i32_0 : i32, i32
  }
  func.func @transform_12(%arg0: i32, %arg1: i32) -> (i32, i32) {
    %c0_i32 = arith.constant 0 : i32
    %c0_i32_0 = arith.constant 0 : i32
    %c0_i32_1 = arith.constant 0 : i32
    return %c0_i32, %c0_i32_0 : i32, i32
  }
  func.func @transform_13(%arg0: i32, %arg1: i32) -> (i32, i32, i32) {
    %c0_i32 = arith.constant 0 : i32
    %c0_i32_0 = arith.constant 0 : i32
    %c0_i32_1 = arith.constant 0 : i32
    %c0_i32_2 = arith.constant 0 : i32
    return %c0_i32, %c0_i32_0, %c0_i32_1 : i32, i32, i32
  }
  func.func @transform_14(%arg0: i32, %arg1: i32) -> (i32, i32, i32) {
    %c0_i32 = arith.constant 0 : i32
    %c0_i32_0 = arith.constant 0 : i32
    %c0_i32_1 = arith.constant 0 : i32
    %c0_i32_2 = arith.constant 0 : i32
    return %c0_i32, %c0_i32_0, %c0_i32_1 : i32, i32, i32
  }
  func.func @transform_15(%arg0: i32, %arg1: i32) -> (i32, i32, i32) {
    %c0_i32 = arith.constant 0 : i32
    %c0_i32_0 = arith.constant 0 : i32
    %c0_i32_1 = arith.constant 0 : i32
    %c0_i32_2 = arith.constant 0 : i32
    return %c0_i32, %c0_i32_0, %c0_i32_1 : i32, i32, i32
  }
  func.func @transform_16(%arg0: i32, %arg1: i32) -> (i32, i32) {
    %c0_i32 = arith.constant 0 : i32
    %c0_i32_0 = arith.constant 0 : i32
    %c0_i32_1 = arith.constant 0 : i32
    return %c0_i32, %c0_i32_0 : i32, i32
  }
  func.func @transform_17(%arg0: i32, %arg1: i32) -> (i32, i32, i32) {
    %c0_i32 = arith.constant 0 : i32
    %c0_i32_0 = arith.constant 0 : i32
    return %arg0, %arg1, %c0_i32 : i32, i32, i32
  }
}

</mosaic_0001>

<bundles_post_ra>
// kernel: tpu_custom_call.1
= control target key start
LH: loop header
LB: loop body
LE: loop exit
PB: predicated region body
PF: predicated region fallthrough
CT: control target
= control target key end

     0   :  { %s3237_s0 = inlined_call_operand.vmem [shape: f32[2,16,32], index: 0, kind: input, shape index: {}]   ;;  %s3238_s1 = inlined_call_operand.hbm [shape: f32[1,32], index: 1, kind: input, shape index: {}]   ;;  %s3239_s2 = inlined_call_operand.vmem [shape: f32[1,32], index: 2, kind: input, shape index: {}]   ;;  %s3240_s3 = inlined_call_operand.vmem [shape: bf16[32,32], index: 3, kind: input, shape index: {}]   ;;  %s3241_s4 = inlined_call_operand.hbm [shape: f32[1,32], index: 4, kind: input, shape index: {}]   ;;  %s3242_s5 = inlined_call_operand.vmem [shape: bf16[32,32], index: 5, kind: input, shape index: {}]   ;;  %s3243_s6 = inlined_call_operand.vmem [shape: f32[1,32], index: 6, kind: input, shape index: {}]   ;;  %s3244_s7 = inlined_call_operand.hbm [shape: bf16[32,32], index: 7, kind: input, shape index: {}]   ;;  %s3245_s8 = inlined_call_operand.vmem [shape: f32[1,32], index: 8, kind: input, shape index: {}]   ;;  %s3246_s9 = inlined_call_operand.hbm [shape: bf16[32,32], index: 9, kind: input, shape index: {}]   ;;  %s3247_s10 = inlined_call_operand.vmem [shape: f32[1,32], index: 10, kind: input, shape index: {}]   ;;  %s3248_s11 = inlined_call_operand.vmem [shape: f32[1,32], index: 11, kind: input, shape index: {}]   ;;  %s3249_s12 = inlined_call_operand.vmem [shape: f32[1,32], index: 12, kind: input, shape index: {}]   ;;  %s3250_s13 = inlined_call_operand.vmem [shape: bf16[2,32,64], index: 13, kind: input, shape index: {}]   ;;  %s3251_s14 = inlined_call_operand.vmem [shape: f32[2,1,64], index: 14, kind: input, shape index: {}]   ;;  %s3252_s15 = inlined_call_operand.vmem [shape: bf16[2,64,32], index: 15, kind: input, shape index: {}]   ;;  %s3253_s16 = inlined_call_operand.vmem [shape: f32[1,32], index: 16, kind: input, shape index: {}]   ;;  %s3254_s17 = inlined_call_operand.hbm [shape: f32[2,16,32], index: 17, kind: output, shape index: {}]  }
   0x1   :  { %3267 = sst [smem:[#allocation30_spill]] %s3237_s0 }
   0x2   :  { %3268 = sst [smem:[#allocation31_spill]] %s3238_s1 }
   0x3   :  { %3269 = sst [smem:[#allocation32_spill]] %s3241_s4 }
   0x4   :  { %3270 = sst [smem:[#allocation33_spill]] %s3251_s14 }
   0x5   :  { %3271 = sst [smem:[#allocation34_spill]] %s3252_s15 }
   0x6   :  { %3272 = sst [smem:[#allocation35_spill]] %s3253_s16 }
   0x7   :  { %3273 = sst [smem:[#allocation36_spill]] %s3254_s17 }
   0x8   :  { %22 = vsyncpa [#allocation8], 0 }
   0x9   :  { %23 = vsyncpa [#allocation11], 0 }
   0xa   :  { %24 = vsyncpa [#allocation14], 0 }
   0xb   :  { %25 = vsyncpa [#allocation9], 0 }
   0xc   :  { %27 = vsyncpa [#allocation9 + $0x1], 0  ;;  %s2761_s24 = smov 0   ;;  %s2763_s25 = smov 0  }
   0xd   :  { %s2765_s26 = smov 0   ;;  %s2767_s27 = smov 0  }
   0xe   :  { %s2769_s28 = smov 0   ;;  %s2771_s29 = smov 0  }
   0xf   :  { %s2773_s0 = smov 0   ;;  %s2775_s30 = smov 0  }
  0x10 LB: > { %3274 = sst [smem:[#allocation20_spill]] %s2523_s24  ;;  %s1713_s18 = sadd.s32 4294967295, %s2551_s30   ;;  %s2551_s30 = sphi %s2775_s30, %s33_s30   ;;  %s2547_s0 = sphi %s2773_s0, %s3323_s0   ;;  %s2543_s29 = sphi %s2771_s29, %s3322_s29   ;;  %s2539_s28 = sphi %s2769_s28, %s3321_s28   ;;  %s2535_s27 = sphi %s2767_s27, %s3320_s27   ;;  %s2531_s26 = sphi %s2765_s26, %s3326_s26   ;;  %s2527_s25 = sphi %s2763_s25, %s3325_s25   ;;  %s2523_s24 = sphi %s2761_s24, %s3324_s24  }
  0x11   : > { %3275 = sst [smem:[#allocation21_spill]] %s2531_s26  ;;  %s1714_s19 = sadd.s32 4294967294, %s2551_s30  }
  0x12   : > { %3276 = sst [smem:[#allocation22_spill]] %s2543_s29  ;;  %s42_s1 = sadd.s32 1, %s2543_s29 }
  0x13   : > { %3277 = sst [smem:[#allocation23_spill]] %s2547_s0  ;;  %s45_s20 = sadd.s32 1, %s2547_s0 }
  0x14   : > { %3278 = sst [smem:[#allocation24_spill]] %s2551_s30  ;;  %p43_p0 = scmp.ge.s32.totalorder %s42_s1, 2 }
  0x15   : > { %s416_s21 = sadd.s32 1, %s2531_s26  ;;  %p426_p1 = scmp.ne.s32.totalorder %s2531_s26, %s2527_s25 }
  0x16   : > { %p427_p2 = scmp.eq.s32.totalorder %s1713_s18, 3  ;;  %s3328_s1 = smov (%p43_p0, %s42_s1), 0 }
  0x17   : > { %3279 = sst [smem:[#allocation25_spill]] %s3328_s1  ;;  %s3330_s20 = smov (!%p43_p0, %s45_s20), %s2547_s0 }
  0x18   : > { %s412_s22 = ssub.s32 %s2543_s29, %s3328_s1  ;;  %p2813_p3 = por %p427_p2, %p426_p1 }
  0x19   : > { %p47_p4 = scmp.ge.s32.totalorder %s3330_s20, 2  ;;  %p432_p5 = scmp.ne.s32.totalorder %s2527_s25, %s2523_s24 }
  0x1a   : > { %s3280_s23 = scalar_select %p2813_p3, 1, 0 }
  0x1b   : > { %p433_p6 = scmp.eq.s32.totalorder %s1714_s19, 3  ;;  %p1715_p7 = scmp.ge.s32.totalorder %s2551_s30, 1 }
  0x1c   : > { %3281 = sst [smem:[#allocation26_spill]] %s3280_s23  ;;  %s3332_s20 = smov (%p47_p4, %s3330_s20), 0 }
  0x1d   : > { %3282 = sst [smem:[#allocation27_spill]] %s3332_s20  ;;  %p2822_p8 = por %p433_p6, %p432_p5 }
  0x1e   : > { %p440_p9 = scmp.lt.s32.totalorder %s2551_s30, 5  ;;  %s411_s16 = ssub.s32 %s2547_s0, %s3332_s20 }
  0x1f   : > { %s3283_s17 = scalar_select %p2822_p8, 1, 0 }
  0x20   : > { %s413_s15 = sor.u32 %s412_s22, %s411_s16  ;;  %p2829_p10 = pnand %p1715_p7, %p440_p9 }
  0x21   : > { %3284 = sst [smem:[#allocation28_spill]] %s3283_s17  ;;  %p414_p11 = scmp.eq.s32.totalorder %s413_s15, 0 }
  0x22   : > { %p2833_p12 = scmp.eq.s32.totalorder %s1713_s18, 0  ;;  %p1865_p13 = pneg %p2829_p10 }
  0x23   : > { %s3287_s4 = sld [smem:[#allocation32_spill]]  ;;  %s2657_s15 = smov [#allocation10]  }
  0x24   : > { %s2843_s30 = scalar_select %p414_p11, %s2531_s26, %s416_s21  }
  0x25   : > { %p2847_p0 = pnand %p2833_p12, %p1865_p13  ;;  %s472_s18 = sshll.u32 %s2657_s15, 4  ;;  %s473_s18 = int_to_ptr.vmem [resolvable:$true] %s472_s18 }
  0x26   : > { %3288 = sst [smem:[#allocation29_spill]] %s2843_s30  ;;  %s2658_s21 = smov [#allocation7]  }
  0x27   : > { %s3290_s24 = sld [smem:[#allocation31_spill]]  ;;  %s487_s26 = sshll.u32 %s3244_s7, 4  ;;  %s488_s26 = int_to_ptr.hbm [resolvable:$true] %s487_s26 }
  0x28   : > { %s2659_s15 = smov [#allocation12]  }
  0x29   : > { %s470_s17 = sshll.u32 %s3287_s4, 4  ;;  %s454_s4 = sshll.u32 %s2658_s21, 4  ;;  %s471_s17 = int_to_ptr.hbm [resolvable:$true] %s470_s17  ;;  %s455_s4 = int_to_ptr.vmem [resolvable:$true] %s454_s4 }
  0x2a   : > { %1871 = dma.hbm_to_vmem [thread:$0]  (!%p2847_p0), %s471_s17, 16, %s473_s18, [#allocation11]  }
  0x2b   : > { %s489_s23 = sshll.u32 %s2659_s15, 4  ;;  %s2660_s17 = smov 64   ;;  %s490_s23 = int_to_ptr.vmem [resolvable:$true] %s489_s23 }
  0x2c   : > { %s2661_s18 = smov 4   ;;  %s2662_s21 = smov [#allocation13]  }
  0x2d   : > { %s452_s19 = sshll.u32 %s3290_s24, 4  ;;  %s504_s24 = sshll.u32 %s3246_s9, 4  ;;  %s453_s19 = int_to_ptr.hbm [resolvable:$true] %s452_s19  ;;  %s505_s24 = int_to_ptr.hbm [resolvable:$true] %s504_s24 }
  0x2e   : > { %1868 = dma.hbm_to_vmem [thread:$0]  (!%p2847_p0), %s453_s19, 16, %s455_s4, [#allocation8]  }
  0x2f   : > { %1874 = dma.hbm_to_vmem [thread:$0]  (!%p2847_p0), %s488_s26, 256, %s490_s23, [#allocation11], %s2660_s17, %s2660_s17, %s2661_s18  }
  0x30   : > { %s506_s14 = sshll.u32 %s2662_s21, 4  ;;  %551 = sbr.rel (%p2829_p10) target bundleno = 4045 (0xfcd), region = 88  ;;  %s507_s14 = int_to_ptr.vmem [resolvable:$true] %s506_s14 }
  0x31   : > { %1877 = dma.hbm_to_vmem [thread:$0]  (!%p2847_p0), %s505_s24, 256, %s507_s14, [#allocation14], %s2660_s17, %s2660_s17, %s2661_s18  }
  0x35   : > { %2506 = dma.done.wait (%p2833_p12), [#allocation8], 16  }
  0x36   : > { %2508 = vsyncadd (%p2833_p12), [#allocation8], 4294967280 }
  0x37   : > { %2510 = dma.done.wait (%p2833_p12), [#allocation11], 272  }
  0x38   : > { %2512 = vsyncadd (%p2833_p12), [#allocation11], 4294967024 }
  0x39   : > { %2514 = dma.done.wait (%p2833_p12), [#allocation14], 256  }
  0x3a   : > { %2516 = vsyncadd (%p2833_p12), [#allocation14], 4294967040  ;;  %s616_s4 = sand.u32 1, %s2527_s25   ;;  %p619_p1 = scmp.lt.s32.totalorder %s2539_s28, 1  ;;  %v2894_v0 = vld [vmem:[#allocation7] sm:$0x1] }
  0x3b   : > { %s2886_s14 = sshll.u32 %s616_s4, 3  ;;  %s3291_s23 = sld [smem:[#allocation30_spill]]  ;;  %v2899_v1 = vld [vmem:[%s3239_s2] sm:$0x1] }
  0x3c   : > { %s620_s26 = scalar_select %p619_p1, %s2539_s28, 1 }
  0x3d   : > { %s618_s15 = scalar_lea.vmem [#allocation15], %s2886_s14  ;;  %p1729_p2 = scmp.ne.s32.totalorder %s2535_s27, 0 }
  0x3e   : > { %s1830_s0 = sshll.u32 %s620_s26, 4  ;;  %s2903_s17 = smov (!%p1729_p2), 0  }
  0x3f   : > { %630 = sbr.rel (%p1729_p2) target bundleno = 475 (0x1db), region = 108 }
  0x41   : > { %s2892_s16 = scalar_lea.vmem %s3291_s23, %s1830_s0 }
  0x44 LB: >> { %s1730_s18 = sshll.u32 %s2555_s17, 3  ;;  %vm640_vm0 = vcmask 261120   ;;  %v2663_v4 = vmov 32.0   ;;  %v1832_v16 = vld [vmem:[%s3242_s5 + $0x8] sm:$0xff]  ;;  %v1831_v18 = vld [vmem:[%s3242_s5] sm:$0xff]  ;;  %v671_v29 = vperm.slane %v2894_v0, 0  ;;  %s2555_s17 = sphi %s2903_s17, %s636_s17  }
  0x45   : >> { %s638_s20 = scalar_lea.vmem %s2892_s16, %s1730_s18  ;;  %2179 = vrcp.f32 %v2663_v4  ;;  %v1834_v17 = vld [vmem:[#allocation12 + $0x8] sm:$0xff]  ;;  %708 = vmatpush.bf16.msra.mxu0 %v1832_v16  ;;  %v1833_v19 = vld [vmem:[#allocation12] sm:$0xff]  ;;  %v675_v32 = vperm.slane %v2899_v1, 0  ;;  %s716_s0 = sshra.s32 %s1730_s18, 3  ;;  %v2177_v36 = vld [vmem:[%s3243_s6] ss:$0 sm:$0xff] }
  0x46   : >> { %v639_v2 = vld [vmem:[%s638_s20] sm:$0xff]  ;;  %748 = vmatpush.bf16.msra.mxu1 %v1834_v17  ;;  %s1740_s19 = sshll.u32 %s716_s0, 2  ;;  %vm720_vm5 = vcmask 257024   ;;  %s636_s17 = sadd.s32 1, %s2555_s17  }
  0x47   : >> { %v641_v3 = vsel %vm640_vm0, %v639_v2, 0.0  ;;  %v2178_v37 = vld [vmem:[%s3245_s8] ss:$0 sm:$0xff]  ;;  %s719_s20 = scalar_lea.vmem [#allocation2], %s1740_s19  ;;  %s757_s22 = scalar_lea.vmem [#allocation3], %s1740_s19 }
  0x48   : >> { %642 = vadd.xlane.f32.xlu0 %v641_v3  ;;  %p633_p4 = scmp.ge.s32.totalorder %s636_s17, 2  }
  0x49   : >> { %709 = vmatpush.bf16.msra.mxu0 %v1831_v18 }
  0x4a   : >> { %749 = vmatpush.bf16.msra.mxu1 %v1833_v19 }
  0x4b   : >> { %v2180_v5 = vpop.eup %2179 }
  0x4c   : >> { %v645_v6 = vmul.f32 32.0, %v2180_v5  ;;  %vm649_vm1 = vweird.f32 %v2180_v5 }
  0x4e   : >> { %v646_v7 = vsub.f32 1.0, %v645_v6 }
  0x50   : >> { %v647_v8 = vmul.f32 %v2180_v5, %v646_v7 }
  0x52   : >> { %v648_v9 = vadd.f32 %v2180_v5, %v647_v8 }
  0x54   : >> { %v650_v10 = vsel %vm649_vm1, %v2180_v5, %v648_v9 }
  0xbb   : >> { %v643_v11 = vpop.xlane.xlu0 %642 }
  0xbc   : >> { %v651_v12 = vmul.f32 %v650_v10, %v643_v11 }
  0xbe   : >> { %v652_v13 = vsub.f32 %v639_v2, %v651_v12 }
  0xc0   : >> { %v653_v14 = vmul.f32 %v652_v13, %v652_v13 }
  0xc2   : >> { %v654_v15 = vsel %vm640_vm0, %v653_v14, 0.0 }
  0xc3   : >> { %655 = vadd.xlane.f32.xlu0 %v654_v15 }
 0x136   : >> { %v656_v20 = vpop.xlane.xlu0 %655 }
 0x137   : >> { %v657_v21 = vmul.f32 %v656_v20, %v650_v10 }
 0x139   : >> { %v658_v22 = vadd.f32 1e-05, %v657_v21 }
 0x13b   : >> { %2181 = vrsqrt.f32 %v658_v22  ;;  %vm665_vm3 = vweird.f32 %v658_v22 }
 0x141   : >> { %v2182_v23 = vpop.eup %2181 }
 0x142   : >> { %v660_v24 = vmul.f32 %v2182_v23, %v658_v22  ;;  %vm666_vm2 = vweird.f32 %v2182_v23 }
 0x143   : >> { %vm667_vm4 = vmor %vm665_vm3, %vm666_vm2 }
 0x144   : >> { %v661_v25 = vmul.f32 %v2182_v23, %v660_v24 }
 0x146   : >> { %v662_v26 = vmul.f32 0.5, %v661_v25 }
 0x148   : >> { %v663_v27 = vsub.f32 1.5, %v662_v26 }
 0x14a   : >> { %v664_v28 = vmul.f32 %v2182_v23, %v663_v27 }
 0x14c   : >> { %v668_v30 = vsel %vm667_vm4, %v2182_v23, %v664_v28 }
 0x14d   : >> { %v669_v31 = vmul.f32 %v668_v30, %v652_v13 }
 0x14f   : >> { %v673_v33 = vmul.f32 %v671_v29, %v669_v31 }
 0x151   : >> { %v677_v34 = vadd.f32 %v675_v32, %v673_v33 }
 0x153   : >> { %v678_v35 = vpack.c.bf16 %v677_v34, %v677_v34 }
 0x155   : >> { %1739 = vmatmul.msk.bf16.vlgmr.msra.gmra.mxu0 %vm640_vm0, %v678_v35  ;;  %1749 = vmatmul.msk.bf16.vlgmr.msra.gmra.mxu1 %vm640_vm0, %v678_v35 }
 0x1d2   : >> { %v711_v38 = vpop.f32.mrf.mxu0  ;;  %v751_v39 = vpop.f32.mrf.mxu1 }
 0x1d3   : >> { %v712_v40 = vadd.f32 %v2177_v36, %v711_v38  ;;  %v752_v41 = vadd.f32 %v2178_v37, %v751_v39 }
 0x1d5   : >> { %v715_v42 = vpack.c.bf16 %v712_v40, %v712_v40  ;;  %v755_v43 = vpack.c.bf16 %v752_v41, %v752_v41 }
 0x1d6   : > { %635 = sbr.rel (!%p633_p4) target bundleno = 68 (0x44), region = 201 }
 0x1d7   : >> { %721 = vst.msk [vmem:[%s719_s20] sm:$0xf] %vm720_vm5, %v715_v42 }
 0x1d8   : >> { %758 = vst.msk [vmem:[%s757_s22] sm:$0xf] %vm720_vm5, %v755_v43 }
 0x1da   : >> { %v713_v44 = vpop.f32.mrf.mxu0  ;;  %v753_v45 = vpop.f32.mrf.mxu1 }
 0x1db PF: > { %s1751_s18 = sshll.u32 %s2535_s27, 3  ;;  %vm762_vm6 = vcmask 261120   ;;  %v2664_v48 = vmov 32.0   ;;  %v1836_v60 = vld [vmem:[%s3240_s3 + $0x8] sm:$0xff]  ;;  %v1835_v61 = vld [vmem:[%s3240_s3] sm:$0xff]  ;;  %v793_v9 = vperm.slane %v2894_v0, 0  ;;  %v841_v16 = vlaneseq }
 0x1dc   : > { %s2937_s24 = scalar_lea.vmem %s2892_s16, %s1751_s18  ;;  %2184 = vrcp.f32 %v2664_v48  ;;  %830 = vmatpush.bf16.msra.mxu0 %v1836_v60  ;;  %v797_v12 = vperm.slane %v2899_v1, 0  ;;  %s2956_s0 = sadd.s32 1, %s2535_s27  ;;  %v2183_v19 = vld [vmem:[#allocation10] ss:$0 sm:$0xff]  ;;  %vm839_vm11 = vcmask 257024   ;;  %v2966_v24 = vmov 0.0  }
 0x1dd   : > { %v761_v46 = vld [vmem:[%s2937_s24] sm:$0xff]  ;;  %v2958_v17 = vshrl.u32 %v841_v16, 7  ;;  %v2960_v18 = vand.u32 127, %v841_v16  ;;  %p1761_p5 = scmp.le.s32.totalorder %s2956_s0, 0  ;;  %v2968_v25 = vmov 0.0  }
 0x1de   : > { %v763_v47 = vsel %vm762_vm6, %v761_v46, 0.0  ;;  %s2972_s30 = smov (!%p1761_p5), 0  }
 0x1df   : > { %764 = vadd.xlane.f32.xlu0 %v763_v47 }
 0x1e0   : > { %831 = vmatpush.bf16.msra.mxu0 %v1835_v61 }
 0x1e2   : > { %v2185_v49 = vpop.eup %2184 }
 0x1e3   : > { %v767_v50 = vmul.f32 32.0, %v2185_v49  ;;  %vm771_vm7 = vweird.f32 %v2185_v49 }
 0x1e5   : > { %v768_v51 = vsub.f32 1.0, %v767_v50 }
 0x1e7   : > { %v769_v52 = vmul.f32 %v2185_v49, %v768_v51 }
 0x1e9   : > { %v770_v53 = vadd.f32 %v2185_v49, %v769_v52 }
 0x1eb   : > { %v2941_v54 = vsel %vm771_vm7, %v2185_v49, %v770_v53 }
 0x252   : > { %v765_v55 = vpop.xlane.xlu0 %764 }
 0x253   : > { %v773_v56 = vmul.f32 %v2941_v54, %v765_v55 }
 0x255   : > { %v774_v57 = vsub.f32 %v761_v46, %v773_v56 }
 0x257   : > { %v775_v58 = vmul.f32 %v774_v57, %v774_v57 }
 0x259   : > { %v776_v59 = vsel %vm762_vm6, %v775_v58, 0.0 }
 0x25a   : > { %777 = vadd.xlane.f32.xlu0 %v776_v59 }
 0x2cd   : > { %v778_v62 = vpop.xlane.xlu0 %777 }
 0x2ce   : > { %v779_v63 = vmul.f32 %v778_v62, %v2941_v54 }
 0x2d0   : > { %v780_v2 = vadd.f32 1e-05, %v779_v63 }
 0x2d2   : > { %2186 = vrsqrt.f32 %v780_v2  ;;  %vm787_vm9 = vweird.f32 %v780_v2 }
 0x2d8   : > { %v2187_v3 = vpop.eup %2186 }
 0x2d9   : > { %v782_v4 = vmul.f32 %v2187_v3, %v780_v2  ;;  %vm788_vm8 = vweird.f32 %v2187_v3 }
 0x2da   : > { %vm789_vm10 = vmor %vm787_vm9, %vm788_vm8 }
 0x2db   : > { %v783_v5 = vmul.f32 %v2187_v3, %v782_v4 }
 0x2dd   : > { %v784_v6 = vmul.f32 0.5, %v783_v5 }
 0x2df   : > { %v785_v7 = vsub.f32 1.5, %v784_v6 }
 0x2e1   : > { %v786_v8 = vmul.f32 %v2187_v3, %v785_v7 }
 0x2e3   : > { %v790_v10 = vsel %vm789_vm10, %v2187_v3, %v786_v8 }
 0x2e4   : > { %v791_v11 = vmul.f32 %v790_v10, %v774_v57 }
 0x2e6   : > { %v795_v13 = vmul.f32 %v793_v9, %v791_v11 }
 0x2e8   : > { %v799_v14 = vadd.f32 %v797_v12, %v795_v13 }
 0x2ea   : > { %v800_v15 = vpack.c.bf16 %v799_v14, %v799_v14 }
 0x2ec   : > { %1760 = vmatmul.msk.bf16.vlgmr.msra.gmra.mxu0 %vm762_vm6, %v800_v15 }
 0x369   : > { %v833_v20 = vpop.f32.mrf.mxu0 }
 0x36a   : > { %v834_v21 = vadd.f32 %v2183_v19, %v833_v20 }
 0x36c   : > { %v837_v0 = vmul.f32 0.35355338, %v834_v21 }
 0x36e   : > { %v838_v22 = vpack.c.bf16 %v837_v0, %v837_v0 }
 0x370   : > { %840 = vst.msk [vmem:[#allocation4] sm:$0xf] %vm839_vm11, %v838_v22 }
 0x371   : > { %v835_v1 = vpop.f32.mrf.mxu0 }
 0x373   : > { %1589 = sbr.rel (%p1761_p5) target bundleno = 1295 (0x50f), region = 206 }
 0x377   : > { %v2963_v23 = vld [vmem:[#allocation4] sm:$0xf] }
 0x378   : > { %v2557_v26 = vmov 0.0   ;;  %v2561_v27 = vmov 0.0   ;;  %v2565_v28 = vmov -1e+30  }
 0x379 LB: >> { %s1762_s1 = sshll.u32 %s2571_s30, 3  ;;  %vm865_vm12 = vcmask 64512   ;;  %p885_p6 = scmp.eq.s32.totalorder %s2571_s30, %s2535_s27  ;;  %vm886_vm13 = vcmp.gt.s32.totalorder %v2960_v18, %v2958_v17  ;;  %vm912_vm0 = vcmask 1043456   ;;  %s2571_s30 = sphi %s2972_s30, %s850_s30   ;;  %v2567_v28 = vphi %v2565_v28, %v2566_v28   ;;  %v2563_v27 = vphi %v2561_v27, %v2562_v27   ;;  %v2559_v26 = vphi %v2557_v26, %v2558_v26  }
 0x37a   : >> { %s857_s23 = sshra.s32 %s1762_s1, 3  ;;  %s850_s30 = sadd.s32 1, %s2571_s30  }
 0x37b   : >> { %s1763_s29 = sshll.u32 %s857_s23, 2  ;;  %p849_p7 = scmp.ge.s32.totalorder %s850_s30, %s2956_s0 }
 0x37c   : >> { %s860_s19 = scalar_lea.vmem [#allocation2], %s1763_s29  ;;  %s863_s22 = scalar_lea.vmem [#allocation3], %s1763_s29 }
 0x37d   : >> { %v861_v29 = vld [vmem:[%s860_s19] sm:$0xf]  ;;  %s887_s20 = scalar_select %p885_p6, 1, 0 }
 0x37e   : >> { %v870_v30 = vsel %vm865_vm12, %v861_v29, 0  ;;  %v864_v36 = vld [vmem:[%s863_s22] sm:$0xf] }
 0x37f   : >> { %879 = vmatpush.bf16.xpose.msra.mxu0 %v870_v30  ;;  %v888_v31 = vstv %s887_s20  ;;  %v914_v37 = vsel %vm912_vm0, %v864_v36, 0 }
 0x380   : >> { %vm889_vm14 = vcmp.eq.s32.totalorder %v888_v31, 1  ;;  %923 = vmatpush.bf16.msra.mxu1 %v914_v37 }
 0x381   : >> { %vm890_vm15 = vmand %vm889_vm14, %vm886_vm13 }
 0x386   : >> { %1765 = vmatmul.msk.bf16.vlgmr.msra.gmra.mxu0 %vm865_vm12, %v2963_v23 }
 0x403   : >> { %v881_v32 = vpop.f32.mrf.mxu0 }
 0x404   : >> { %v891_v33 = vsel %vm890_vm15, -10000.0, %v881_v32 }
 0x405   : >> { %v892_v34 = vsel %vm865_vm12, %v891_v33, -inf }
 0x406   : >> { %893 = vmax.xlane.f32.xlu0 %v892_v34 }
 0x40b   : >> { %v883_v35 = vpop.f32.mrf.mxu0 }
 0x479   : >> { %v894_v38 = vpop.xlane.xlu0 %893 }
 0x47a   : >> { %v895_v39 = vmax.f32 %v2567_v28, %v894_v38  }
 0x47c   : >> { %v896_v40 = vsub.f32 %v2567_v28, %v895_v39  ;;  %v899_v41 = vsub.f32 %v891_v33, %v895_v39  ;;  %v2566_v28 = vmov %v895_v39  }
 0x47e   : >> { %v900_v42 = vmul.f32 1.442695, %v899_v41  ;;  %v897_v46 = vmul.f32 1.442695, %v896_v40 }
 0x480   : >> { %2188 = vpow2.f32 %v900_v42 }
 0x481   : >> { %2190 = vpow2.f32 %v897_v46 }
 0x486   : >> { %v2189_v43 = vpop.eup %2188 }
 0x487   : >> { %v903_v44 = vsel %vm865_vm12, %v2189_v43, 0.0  ;;  %v908_v45 = vpack.c.bf16 %v2189_v43, %v2189_v43  ;;  %v2191_v47 = vpop.eup %2190 }
 0x488   : >> { %904 = vadd.xlane.f32.xlu0 %v903_v44  ;;  %v902_v48 = vmul.f32 %v2563_v27, %v2191_v47  ;;  %v907_v51 = vmul.f32 %v2559_v26, %v2191_v47 }
 0x489   : >> { %1766 = vmatmul.msk.bf16.vlgmr.msra.gmra.mxu1 %vm865_vm12, %v908_v45 }
 0x4fb   : >> { %v905_v49 = vpop.xlane.xlu0 %904 }
 0x4fc   : >> { %v906_v50 = vadd.f32 %v905_v49, %v902_v48  }
 0x4fe   : >> { %v2562_v27 = vmov %v906_v50   ;;  %v3293_v25 = vmov (%p849_p7), %v906_v50 }
 0x506   : >> { %v925_v52 = vpop.f32.mrf.mxu1 }
 0x507   : >> { %v929_v53 = vadd.f32 %v925_v52, %v907_v51  }
 0x509   : >> { %v2558_v26 = vmov %v929_v53   ;;  %v3292_v24 = vmov (%p849_p7), %v929_v53 }
 0x50a   : > { %852 = sbr.rel (!%p849_p7) target bundleno = 889 (0x379), region = 212 }
 0x50e   : >> { %v927_v55 = vpop.f32.mrf.mxu1 }
 0x50f PF: > { %2192 = vrcp.f32 %v2579_v25  ;;  %v2998_v56 = vld [vmem:[#allocation4] sm:$0xf]  ;;  %vm933_vm1 = vcmask 60416   ;;  %v3000_v60 = vmov 0.0   ;;  %v3002_v61 = vmov 0.0   ;;  %s3012_s18 = smov (!%p1761_p5), 0   ;;  %v2579_v25 = vphi %v2968_v25, %v3293_v25   ;;  %v2575_v24 = vphi %v2966_v24, %v3292_v24  }
 0x515   : > { %v2193_v57 = vpop.eup %2192 }
 0x516   : > { %v931_v58 = vmul.f32 %v2575_v24, %v2193_v57  ;;  %1603 = sbr.rel (%p1761_p5) target bundleno = 1846 (0x736), region = 217 }
 0x518   : > { %v932_v59 = vpack.c.bf16 %v931_v58, %v931_v58 }
 0x51a   : > { %934 = vst.msk [vmem:[#allocation5] sm:$0xf] %vm933_vm1, %v932_v59 }
 0x51b   : > { %v3006_v62 = vmov 0.0   ;;  %v3008_v63 = vmov 0.0   ;;  %v3010_v2 = vmov -1e+30  }
 0x51c LB: >> { %s1768_s16 = sshll.u32 %s2595_s18, 3  ;;  %s2665_s30 = smov 120   ;;  %v955_v6 = vunpack.c.l.b16 %v2998_v56  ;;  %vm964_vm2 = vcmask 64512   ;;  %vm985_vm3 = vcmp.gt.s32.totalorder %v2960_v18, %v2958_v17  ;;  %vm1016_vm7 = vcmask 1043456   ;;  %s2595_s18 = sphi %s3012_s18, %s939_s18   ;;  %v2591_v2 = vphi %v3010_v2, %v3296_v2   ;;  %v2587_v63 = vphi %v3008_v63, %v3295_v63   ;;  %v2583_v62 = vphi %v3006_v62, %v3294_v62  }
 0x51d   : >> { %s946_s17 = sshra.s32 %s1768_s16, 3  ;;  %p984_p9 = scmp.eq.s32.totalorder %s2595_s18, %s2535_s27 }
 0x51e   : >> { %s1769_s21 = sshll.u32 %s946_s17, 2  ;;  %v956_v7 = vpack.c.b16 %v955_v6, %v955_v6  ;;  %s939_s18 = sadd.s32 1, %s2595_s18  }
 0x51f   : >> { %s949_s26 = scalar_lea.vmem [#allocation2], %s1769_s21  ;;  %s952_s23 = scalar_lea.vmem [#allocation3], %s1769_s21 }
 0x520   : >> { %v950_v3 = vld [vmem:[%s949_s26] sm:$0xf]  ;;  %s986_s1 = scalar_select %p984_p9, 1, 0 }
 0x521   : >> { %v960_v4 = vunpack.c.l.b16 %v950_v3  ;;  %v953_v16 = vld [vmem:[%s952_s23] sm:$0xf]  ;;  %p938_p10 = scmp.ge.s32.totalorder %s939_s18, %s2956_s0 }
 0x522   : >> { %v987_v11 = vstv %s986_s1  ;;  %v1009_v19 = vunpack.c.l.b16 %v953_v16 }
 0x523   : >> { %v961_v5 = vpack.c.b16 %v960_v4, %v960_v4  ;;  %vm988_vm4 = vcmp.eq.s32.totalorder %v987_v11, 1 }
 0x524   : >> { %vm989_vm5 = vmand %vm988_vm4, %vm985_vm3  ;;  %v1010_v20 = vpack.c.b16 %v1009_v19, %v1009_v19 }
 0x525   : >> { %962 = vrot.lane.b32.xlu0 %v961_v5, %s2665_s30 }
 0x52d   : >> { %957 = vrot.lane.b32.xlu0 %v956_v7, %s2665_s30 }
 0x597   : >> { %v963_v8 = vpop.permute.xlu0 %962 }
 0x598   : >> { %v969_v9 = vsel %vm964_vm2, %v963_v8, 0 }
 0x599   : >> { %978 = vmatpush.bf16.xpose.msra.mxu0 %v969_v9 }
 0x59f   : >> { %v958_v10 = vpop.permute.xlu0 %957 }
 0x5a0   : >> { %1771 = vmatmul.msk.bf16.vlgmr.msra.gmra.mxu0 %vm964_vm2, %v958_v10 }
 0x61d   : >> { %v980_v12 = vpop.f32.mrf.mxu0 }
 0x61e   : >> { %v990_v13 = vsel %vm989_vm5, -10000.0, %v980_v12 }
 0x61f   : >> { %v991_v14 = vsel %vm964_vm2, %v990_v13, -inf }
 0x620   : >> { %992 = vmax.xlane.f32.xlu1 %v991_v14 }
 0x625   : >> { %v982_v15 = vpop.f32.mrf.mxu0 }
 0x639   : >> { %1011 = vrot.lane.b32.xlu1 %v1010_v20, %s2665_s30 }
 0x693   : >> { %v993_v21 = vpop.xlane.xlu1 %992 }
 0x694   : >> { %v994_v0 = vmax.f32 %v2591_v2, %v993_v21  }
 0x696   : >> { %v995_v22 = vsub.f32 %v2591_v2, %v994_v0  ;;  %v998_v1 = vsub.f32 %v990_v13, %v994_v0  ;;  %v3296_v2 = vmov %v994_v0 }
 0x698   : >> { %v999_v23 = vmul.f32 1.442695, %v998_v1  ;;  %v996_v29 = vmul.f32 1.442695, %v995_v22 }
 0x69a   : >> { %2194 = vpow2.f32 %v999_v23 }
 0x69b   : >> { %2196 = vpow2.f32 %v996_v29 }
 0x6a0   : >> { %v2195_v24 = vpop.eup %2194 }
 0x6a1   : >> { %v1002_v25 = vsel %vm964_vm2, %v2195_v24, 0.0  ;;  %v1007_v28 = vpack.c.bf16 %v2195_v24, %v2195_v24  ;;  %v2197_v30 = vpop.eup %2196 }
 0x6a2   : >> { %1003 = vadd.xlane.f32.xlu2 %v1002_v25  ;;  %v1001_v31 = vmul.f32 %v2587_v63, %v2197_v30  ;;  %v1006_v34 = vmul.f32 %v2583_v62, %v2197_v30 }
 0x6ab   : >> { %v1012_v26 = vpop.permute.xlu1 %1011 }
 0x6ac   : >> { %v1018_v27 = vsel %vm1016_vm7, %v1012_v26, 0 }
 0x6ad   : >> { %1027 = vmatpush.bf16.msra.mxu1 %v1018_v27 }
 0x6b0   : >> { %1772 = vmatmul.msk.bf16.vlgmr.msra.gmra.mxu1 %vm964_vm2, %v1007_v28 }
 0x715   : >> { %v1004_v32 = vpop.xlane.xlu2 %1003 }
 0x716   : >> { %v1005_v33 = vadd.f32 %v1004_v32, %v1001_v31  }
 0x718   : >> { %v3295_v63 = vmov %v1005_v33  ;;  %v3298_v61 = vmov (%p938_p10), %v1005_v33 }
 0x72d   : >> { %v1029_v35 = vpop.f32.mrf.mxu1 }
 0x72e   : >> { %v1033_v36 = vadd.f32 %v1029_v35, %v1006_v34  }
 0x730   : >> { %v3294_v62 = vmov %v1033_v36  ;;  %v3297_v60 = vmov (%p938_p10), %v1033_v36 }
 0x731   : > { %941 = sbr.rel (!%p938_p10) target bundleno = 1308 (0x51c), region = 223 }
 0x735   : >> { %v1031_v37 = vpop.f32.mrf.mxu1 }
 0x736 PF: > { %2198 = vrcp.f32 %v2603_v61  ;;  %s2666_s29 = smov 8   ;;  %v3047_v41 = vld [vmem:[#allocation4] sm:$0xf]  ;;  %vm1041_vm8 = vcmask 126016   ;;  %v3049_v43 = vmov 0.0   ;;  %v3051_v44 = vmov 0.0   ;;  %v2603_v61 = vphi %v3002_v61, %v3298_v61   ;;  %v2599_v60 = vphi %v3000_v60, %v3297_v60  }
 0x737   : > { %s3061_s19 = smov (!%p1761_p5), 0  }
 0x73c   : > { %v2199_v38 = vpop.eup %2198 }
 0x73d   : > { %v1035_v39 = vmul.f32 %v2599_v60, %v2199_v38 }
 0x73f   : > { %v1036_v40 = vpack.c.bf16 %v1035_v39, %v1035_v39 }
 0x741   : > { %1038 = vrot.lane.b32.xlu0 %v1036_v40, %s2666_s29 }
 0x7b0   : > { %1617 = sbr.rel (%p1761_p5) target bundleno = 2512 (0x9d0), region = 228 }
 0x7b3   : > { %v1039_v42 = vpop.permute.xlu0 %1038 }
 0x7b4   : > { %1042 = vst.msk [vmem:[#allocation5] sm:$0xf] %vm1041_vm8, %v1039_v42 }
 0x7b5   : > { %v3055_v45 = vmov 0.0   ;;  %v3057_v46 = vmov 0.0   ;;  %v3059_v47 = vmov -1e+30  }
 0x7b6 LB: >> { %s1774_s20 = sshll.u32 %s2619_s19, 3  ;;  %s2667_s17 = smov 112   ;;  %v1063_v51 = vunpack.c.l.b16 %v3047_v41  ;;  %vm1072_vm9 = vcmask 64512   ;;  %vm1093_vm10 = vcmp.gt.s32.totalorder %v2960_v18, %v2958_v17  ;;  %vm1124_vm14 = vcmask 1043456   ;;  %s2619_s19 = sphi %s3061_s19, %s1047_s19   ;;  %v2615_v47 = vphi %v3059_v47, %v3301_v47   ;;  %v2611_v46 = vphi %v3057_v46, %v3300_v46   ;;  %v2607_v45 = vphi %v3055_v45, %v3299_v45  }
 0x7b7   : >> { %s1054_s22 = sshra.s32 %s1774_s20, 3  ;;  %p1092_p11 = scmp.eq.s32.totalorder %s2619_s19, %s2535_s27 }
 0x7b8   : >> { %s1775_s18 = sshll.u32 %s1054_s22, 2  ;;  %v1064_v52 = vpack.c.b16 %v1063_v51, %v1063_v51  ;;  %s1047_s19 = sadd.s32 1, %s2619_s19  }
 0x7b9   : >> { %s1057_s16 = scalar_lea.vmem [#allocation2], %s1775_s18  ;;  %s1060_s26 = scalar_lea.vmem [#allocation3], %s1775_s18 }
 0x7ba   : >> { %v1058_v48 = vld [vmem:[%s1057_s16] sm:$0xf]  ;;  %s1094_s21 = scalar_select %p1092_p11, 1, 0 }
 0x7bb   : >> { %v1068_v49 = vunpack.c.l.b16 %v1058_v48  ;;  %v1061_v62 = vld [vmem:[%s1060_s26] sm:$0xf]  ;;  %p1046_p12 = scmp.ge.s32.totalorder %s1047_s19, %s2956_s0 }
 0x7bc   : >> { %v1095_v57 = vstv %s1094_s21  ;;  %v1117_v63 = vunpack.c.l.b16 %v1061_v62 }
 0x7bd   : >> { %v1069_v50 = vpack.c.b16 %v1068_v49, %v1068_v49  ;;  %vm1096_vm12 = vcmp.eq.s32.totalorder %v1095_v57, 1 }
 0x7be   : >> { %vm1097_vm13 = vmand %vm1096_vm12, %vm1093_vm10  ;;  %v1118_v2 = vpack.c.b16 %v1117_v63, %v1117_v63 }
 0x7bf   : >> { %1070 = vrot.lane.b32.xlu0 %v1069_v50, %s2667_s17 }
 0x7c7   : >> { %1065 = vrot.lane.b32.xlu0 %v1064_v52, %s2667_s17 }
 0x831   : >> { %v1071_v53 = vpop.permute.xlu0 %1070 }
 0x832   : >> { %v1077_v55 = vsel %vm1072_vm9, %v1071_v53, 0 }
 0x833   : >> { %1086 = vmatpush.bf16.xpose.msra.mxu0 %v1077_v55 }
 0x839   : >> { %v1066_v56 = vpop.permute.xlu0 %1065 }
 0x83a   : >> { %1777 = vmatmul.msk.bf16.vlgmr.msra.gmra.mxu0 %vm1072_vm9, %v1066_v56 }
 0x8b7   : >> { %v1088_v58 = vpop.f32.mrf.mxu0 }
 0x8b8   : >> { %v1098_v59 = vsel %vm1097_vm13, -10000.0, %v1088_v58 }
 0x8b9   : >> { %v1099_v60 = vsel %vm1072_vm9, %v1098_v59, -inf }
 0x8ba   : >> { %1100 = vmax.xlane.f32.xlu1 %v1099_v60 }
 0x8bf   : >> { %v1090_v61 = vpop.f32.mrf.mxu0 }
 0x8d3   : >> { %1119 = vrot.lane.b32.xlu1 %v1118_v2, %s2667_s17 }
 0x92d   : >> { %v1101_v3 = vpop.xlane.xlu1 %1100 }
 0x92e   : >> { %v1102_v4 = vmax.f32 %v2615_v47, %v1101_v3  }
 0x930   : >> { %v1103_v5 = vsub.f32 %v2615_v47, %v1102_v4  ;;  %v1106_v6 = vsub.f32 %v1098_v59, %v1102_v4  ;;  %v3301_v47 = vmov %v1102_v4 }
 0x932   : >> { %v1107_v7 = vmul.f32 1.442695, %v1106_v6  ;;  %v1104_v13 = vmul.f32 1.442695, %v1103_v5 }
 0x934   : >> { %2200 = vpow2.f32 %v1107_v7 }
 0x935   : >> { %2202 = vpow2.f32 %v1104_v13 }
 0x93a   : >> { %v2201_v8 = vpop.eup %2200 }
 0x93b   : >> { %v1110_v9 = vsel %vm1072_vm9, %v2201_v8, 0.0  ;;  %v1115_v12 = vpack.c.bf16 %v2201_v8, %v2201_v8  ;;  %v2203_v14 = vpop.eup %2202 }
 0x93c   : >> { %1111 = vadd.xlane.f32.xlu2 %v1110_v9  ;;  %v1109_v15 = vmul.f32 %v2611_v46, %v2203_v14  ;;  %v1114_v20 = vmul.f32 %v2607_v45, %v2203_v14 }
 0x945   : >> { %v1120_v10 = vpop.permute.xlu1 %1119 }
 0x946   : >> { %v1126_v11 = vsel %vm1124_vm14, %v1120_v10, 0 }
 0x947   : >> { %1135 = vmatpush.bf16.msra.mxu1 %v1126_v11 }
 0x94a   : >> { %1778 = vmatmul.msk.bf16.vlgmr.msra.gmra.mxu1 %vm1072_vm9, %v1115_v12 }
 0x9af   : >> { %v1112_v16 = vpop.xlane.xlu2 %1111 }
 0x9b0   : >> { %v1113_v19 = vadd.f32 %v1112_v16, %v1109_v15  }
 0x9b2   : >> { %v3300_v46 = vmov %v1113_v19  ;;  %v3303_v44 = vmov (%p1046_p12), %v1113_v19 }
 0x9c7   : >> { %v1137_v21 = vpop.f32.mrf.mxu1 }
 0x9c8   : >> { %v1141_v0 = vadd.f32 %v1137_v21, %v1114_v20  }
 0x9ca   : >> { %v3299_v45 = vmov %v1141_v0  ;;  %v3302_v43 = vmov (%p1046_p12), %v1141_v0 }
 0x9cb   : > { %1049 = sbr.rel (!%p1046_p12) target bundleno = 1974 (0x7b6), region = 234 }
 0x9cf   : >> { %v1139_v22 = vpop.f32.mrf.mxu1 }
 0x9d0 PF: > { %2204 = vrcp.f32 %v2627_v44  ;;  %s2668_s30 = smov 16   ;;  %v3096_v25 = vld [vmem:[#allocation4] sm:$0xf]  ;;  %vm1149_vm15 = vcmask 191616   ;;  %v3098_v27 = vmov 0.0   ;;  %v3100_v28 = vmov 0.0   ;;  %v2627_v44 = vphi %v3051_v44, %v3303_v44   ;;  %v2623_v43 = vphi %v3049_v43, %v3302_v43  }
 0x9d1   : > { %s3110_s1 = smov (!%p1761_p5), 0  }
 0x9d6   : > { %v2205_v1 = vpop.eup %2204 }
 0x9d7   : > { %v1143_v23 = vmul.f32 %v2623_v43, %v2205_v1 }
 0x9d9   : > { %v1144_v24 = vpack.c.bf16 %v1143_v23, %v1143_v23 }
 0x9db   : > { %1146 = vrot.lane.b32.xlu0 %v1144_v24, %s2668_s30 }
 0xa4a   : > { %1631 = sbr.rel (%p1761_p5) target bundleno = 3178 (0xc6a), region = 239 }
 0xa4d   : > { %v1147_v26 = vpop.permute.xlu0 %1146 }
 0xa4e   : > { %1150 = vst.msk [vmem:[#allocation5] sm:$0xf] %vm1149_vm15, %v1147_v26 }
 0xa4f   : > { %v3104_v29 = vmov 0.0   ;;  %v3106_v30 = vmov 0.0   ;;  %v3108_v31 = vmov -1e+30  }
 0xa50 LB: >> { %s1780_s23 = sshll.u32 %s2643_s1, 3  ;;  %s2669_s22 = smov 104   ;;  %v1171_v35 = vunpack.c.l.b16 %v3096_v25  ;;  %vm1180_vm0 = vcmask 64512   ;;  %vm1201_vm1 = vcmp.gt.s32.totalorder %v2960_v18, %v2958_v17  ;;  %vm1232_vm4 = vcmask 1043456   ;;  %s2643_s1 = sphi %s3110_s1, %s1155_s1   ;;  %v2639_v31 = vphi %v3108_v31, %v3306_v31   ;;  %v2635_v30 = vphi %v3106_v30, %v3305_v30   ;;  %v2631_v29 = vphi %v3104_v29, %v3304_v29  }
 0xa51   : >> { %s1162_s29 = sshra.s32 %s1780_s23, 3  ;;  %p1200_p13 = scmp.eq.s32.totalorder %s2643_s1, %s2535_s27 }
 0xa52   : >> { %s1781_s19 = sshll.u32 %s1162_s29, 2  ;;  %v1172_v36 = vpack.c.b16 %v1171_v35, %v1171_v35  ;;  %s1155_s1 = sadd.s32 1, %s2643_s1  }
 0xa53   : >> { %s1165_s20 = scalar_lea.vmem [#allocation2], %s1781_s19  ;;  %s1168_s16 = scalar_lea.vmem [#allocation3], %s1781_s19 }
 0xa54   : >> { %v1166_v32 = vld [vmem:[%s1165_s20] sm:$0xf]  ;;  %s1202_s18 = scalar_select %p1200_p13, 1, 0 }
 0xa55   : >> { %v1176_v33 = vunpack.c.l.b16 %v1166_v32  ;;  %v1169_v45 = vld [vmem:[%s1168_s16] sm:$0xf]  ;;  %p1154_p0 = scmp.ge.s32.totalorder %s1155_s1, %s2956_s0 }
 0xa56   : >> { %v1203_v40 = vstv %s1202_s18  ;;  %v1225_v46 = vunpack.c.l.b16 %v1169_v45 }
 0xa57   : >> { %v1177_v34 = vpack.c.b16 %v1176_v33, %v1176_v33  ;;  %vm1204_vm2 = vcmp.eq.s32.totalorder %v1203_v40, 1 }
 0xa58   : >> { %vm1205_vm3 = vmand %vm1204_vm2, %vm1201_vm1  ;;  %v1226_v47 = vpack.c.b16 %v1225_v46, %v1225_v46 }
 0xa59   : >> { %1178 = vrot.lane.b32.xlu0 %v1177_v34, %s2669_s22 }
 0xa61   : >> { %1173 = vrot.lane.b32.xlu0 %v1172_v36, %s2669_s22 }
 0xacb   : >> { %v1179_v37 = vpop.permute.xlu0 %1178 }
 0xacc   : >> { %v1185_v38 = vsel %vm1180_vm0, %v1179_v37, 0 }
 0xacd   : >> { %1194 = vmatpush.bf16.xpose.msra.mxu0 %v1185_v38 }
 0xad3   : >> { %v1174_v39 = vpop.permute.xlu0 %1173 }
 0xad4   : >> { %1783 = vmatmul.msk.bf16.vlgmr.msra.gmra.mxu0 %vm1180_vm0, %v1174_v39 }
 0xb51   : >> { %v1196_v41 = vpop.f32.mrf.mxu0 }
 0xb52   : >> { %v1206_v42 = vsel %vm1205_vm3, -10000.0, %v1196_v41 }
 0xb53   : >> { %v1207_v43 = vsel %vm1180_vm0, %v1206_v42, -inf }
 0xb54   : >> { %1208 = vmax.xlane.f32.xlu1 %v1207_v43 }
 0xb59   : >> { %v1198_v44 = vpop.f32.mrf.mxu0 }
 0xb6d   : >> { %1227 = vrot.lane.b32.xlu1 %v1226_v47, %s2669_s22 }
 0xbc7   : >> { %v1209_v48 = vpop.xlane.xlu1 %1208 }
 0xbc8   : >> { %v1210_v49 = vmax.f32 %v2639_v31, %v1209_v48  }
 0xbca   : >> { %v1211_v50 = vsub.f32 %v2639_v31, %v1210_v49  ;;  %v1214_v51 = vsub.f32 %v1206_v42, %v1210_v49  ;;  %v3306_v31 = vmov %v1210_v49 }
 0xbcc   : >> { %v1215_v52 = vmul.f32 1.442695, %v1214_v51  ;;  %v1212_v59 = vmul.f32 1.442695, %v1211_v50 }
 0xbce   : >> { %2206 = vpow2.f32 %v1215_v52 }
 0xbcf   : >> { %2208 = vpow2.f32 %v1212_v59 }
 0xbd4   : >> { %v2207_v53 = vpop.eup %2206 }
 0xbd5   : >> { %v1218_v55 = vsel %vm1180_vm0, %v2207_v53, 0.0  ;;  %v1223_v58 = vpack.c.bf16 %v2207_v53, %v2207_v53  ;;  %v2209_v60 = vpop.eup %2208 }
 0xbd6   : >> { %1219 = vadd.xlane.f32.xlu2 %v1218_v55  ;;  %v1217_v61 = vmul.f32 %v2635_v30, %v2209_v60  ;;  %v1222_v2 = vmul.f32 %v2631_v29, %v2209_v60 }
 0xbdf   : >> { %v1228_v56 = vpop.permute.xlu1 %1227 }
 0xbe0   : >> { %v1234_v57 = vsel %vm1232_vm4, %v1228_v56, 0 }
 0xbe1   : >> { %1243 = vmatpush.bf16.msra.mxu1 %v1234_v57 }
 0xbe4   : >> { %1784 = vmatmul.msk.bf16.vlgmr.msra.gmra.mxu1 %vm1180_vm0, %v1223_v58 }
 0xc49   : >> { %v1220_v62 = vpop.xlane.xlu2 %1219 }
 0xc4a   : >> { %v1221_v63 = vadd.f32 %v1220_v62, %v1217_v61  }
 0xc4c   : >> { %v3305_v30 = vmov %v1221_v63  ;;  %v3308_v28 = vmov (%p1154_p0), %v1221_v63 }
 0xc61   : >> { %v1245_v3 = vpop.f32.mrf.mxu1 }
 0xc62   : >> { %v1249_v4 = vadd.f32 %v1245_v3, %v1222_v2  }
 0xc64   : >> { %v3304_v29 = vmov %v1249_v4  ;;  %v3307_v27 = vmov (%p1154_p0), %v1249_v4 }
 0xc65   : > { %1157 = sbr.rel (!%p1154_p0) target bundleno = 2640 (0xa50), region = 245 }
 0xc69   : >> { %v1247_v5 = vpop.f32.mrf.mxu1 }
 0xc6a PF: > { %2213 = vrcp.f32 %v2651_v28  ;;  %s2670_s17 = smov 24   ;;  %v1838_v9 = vld [vmem:[#allocation13 + $0x8] sm:$0xff]  ;;  %v1837_v10 = vld [vmem:[#allocation13] sm:$0xff]  ;;  %vm1257_vm5 = vcmask 257216   ;;  %s3162_s23 = smov 0   ;;  %v2651_v28 = vphi %v3100_v28, %v3308_v28   ;;  %v2647_v27 = vphi %v3098_v27, %v3307_v27  }
 0xc6b   : > { %1289 = vmatpush.bf16.msra.mxu0 %v1838_v9  ;;  %v2210_v11 = vld [vmem:[%s3247_s10] ss:$0 sm:$0xff] }
 0xc6c   : > { %v1296_v13 = vld [vmem:[%s2937_s24] sm:$0xff] }
 0xc6d   : > { %v2211_v32 = vld [vmem:[%s3248_s11] ss:$0 sm:$0xff] }
 0xc6f   : > { %1290 = vmatpush.bf16.msra.mxu0 %v1837_v10 }
 0xc70   : > { %v2214_v6 = vpop.eup %2213 }
 0xc71   : > { %v1251_v7 = vmul.f32 %v2647_v27, %v2214_v6 }
 0xc73   : > { %v1252_v8 = vpack.c.bf16 %v1251_v7, %v1251_v7 }
 0xc75   : > { %1254 = vrot.lane.b32.xlu0 %v1252_v8, %s2670_s17 }
 0xce7   : > { %v1255_v17 = vpop.permute.xlu0 %1254 }
 0xce8   : > { %1258 = vst.msk [vmem:[#allocation5] sm:$0xf] %vm1257_vm5, %v1255_v17 }
 0xcef   : > { %v1259_v18 = vld [vmem:[#allocation5] sm:$0xf] }
 0xcf0   : > { %1793 = vmatmul.msk.bf16.vlgmr.msra.gmra.mxu0 %vm762_vm6, %v1259_v18 }
 0xd6d   : > { %v1292_v12 = vpop.f32.mrf.mxu0 }
 0xd6e   : > { %v1293_v14 = vadd.f32 %v2210_v11, %v1292_v12 }
 0xd70   : > { %v1297_v15 = vadd.f32 %v1296_v13, %v1293_v14 }
 0xd72   : > { %1332 = vst.msk [vmem:[#allocation6] sm:$0xff] %vm762_vm6, %v1297_v15  ;;  %v1300_v16 = vsel %vm762_vm6, %v1297_v15, 0.0 }
 0xd73   : > { %1301 = vadd.xlane.f32.xlu0 %v1300_v16 }
 0xd75   : > { %v1294_v19 = vpop.f32.mrf.mxu0 }
 0xde6   : > { %v1302_v20 = vpop.xlane.xlu0 %1301 }
 0xde7   : > { %v1303_v21 = vmul.f32 %v1302_v20, %v2941_v54 }
 0xde9   : > { %v1304_v0 = vsub.f32 %v1297_v15, %v1303_v21 }
 0xdeb   : > { %v1305_v22 = vmul.f32 %v1304_v0, %v1304_v0 }
 0xded   : > { %v1306_v1 = vsel %vm762_vm6, %v1305_v22, 0.0 }
 0xdee   : > { %1307 = vadd.xlane.f32.xlu1 %v1306_v1 }
 0xe61   : > { %v1308_v23 = vpop.xlane.xlu1 %1307 }
 0xe62   : > { %v1309_v24 = vmul.f32 %v1308_v23, %v2941_v54  ;;  %v2212_v54 = vld [vmem:[%s3249_s12] ss:$0 sm:$0xff] }
 0xe64   : > { %v1310_v25 = vadd.f32 1e-05, %v1309_v24 }
 0xe66   : > { %2215 = vrsqrt.f32 %v1310_v25  ;;  %vm1317_vm8 = vweird.f32 %v1310_v25 }
 0xe6c   : > { %v2216_v26 = vpop.eup %2215 }
 0xe6d   : > { %v1312_v27 = vmul.f32 %v2216_v26, %v1310_v25  ;;  %vm1318_vm7 = vweird.f32 %v2216_v26 }
 0xe6e   : > { %vm1319_vm9 = vmor %vm1317_vm8, %vm1318_vm7 }
 0xe6f   : > { %v1313_v28 = vmul.f32 %v2216_v26, %v1312_v27 }
 0xe71   : > { %v1314_v29 = vmul.f32 0.5, %v1313_v28 }
 0xe73   : > { %v1315_v30 = vsub.f32 1.5, %v1314_v29 }
 0xe75   : > { %v1316_v31 = vmul.f32 %v2216_v26, %v1315_v30 }
 0xe77   : > { %v1320_v33 = vsel %vm1319_vm9, %v2216_v26, %v1316_v31 }
 0xe78   : > { %v1321_v34 = vmul.f32 %v1320_v33, %v1304_v0 }
 0xe7a   : > { %v1325_v35 = vmul.f32 %v2211_v32, %v1321_v34 }
 0xe7c   : > { %v1329_v36 = vadd.f32 %v2212_v54, %v1325_v35 }
 0xe7e   : > { %v1330_v37 = vpack.c.bf16 %v1329_v36, %v1329_v36 }
 0xe80   : > { %1331 = vst.msk [vmem:[#allocation4] sm:$0xf] %vm839_vm11, %v1330_v37 }
 0xe81 LB: >> { %s1839_s29 = sshll.u32 %s2655_s23, 4  ;;  %s3309_s17 = sld [smem:[#allocation33_spill]]  ;;  %vm1461_vm14 = vcmask 523264   ;;  %v1424_v26 = vld [vmem:[#allocation6] sm:$0xff]  ;;  %s2655_s23 = sphi %s3162_s23, %s1338_s23  }
 0xe82   : >> { %s1342_s22 = scalar_lea.vmem %s3250_s13, %s1839_s29  ;;  %s1842_s21 = sshll.u32 %s2655_s23, 5 }
 0xe83   : >> { %v1841_v38 = vld [vmem:[%s1342_s22 + $0x8] sm:$0xff]  ;;  %v1840_v39 = vld [vmem:[%s1342_s22] sm:$0xff]  ;;  %s3310_s30 = sld [smem:[#allocation34_spill]] }
 0xe84   : >> { %1373 = vmatpush.bf16.msra.mxu0 %v1841_v38 }
 0xe87   : >> { %s1347_s0 = scalar_lea.vmem %s3309_s17, %s2655_s23  ;;  %v1339_v40 = vld [vmem:[#allocation4] sm:$0xf]  ;;  %s1338_s23 = sadd.s32 1, %s2655_s23  }
 0xe88   : >> { %1374 = vmatpush.bf16.msra.mxu0 %v1840_v39  ;;  %v2217_v41 = vld [vmem:[%s1347_s0] ss:$0 sm:$0xff]  ;;  %p1335_p1 = scmp.ge.s32.totalorder %s1338_s23, 2  }
 0xe89   : >> { %s1428_s1 = scalar_lea.vmem %s3310_s30, %s1842_s21  ;;  %s3311_s20 = sld [smem:[#allocation35_spill]] (%p1335_p1) }
 0xe8a   : >> { %v1846_v48 = vld [vmem:[%s1428_s1 + $0x18] sm:$0xff]  ;;  %v1845_v53 = vld [vmem:[%s1428_s1 + $0x10] sm:$0xff]  ;;  %v1844_v57 = vld [vmem:[%s1428_s1 + $0x8] sm:$0xff]  ;;  %s1826_s18 = sshll.u32 (%p1335_p1), %s2539_s28, 1  ;;  %s1502_s16 = sshll.u32 (%p1335_p1), %s618_s15, 4  ;;  %s1503_s16 = int_to_ptr.vmem [resolvable:$true] %s1502_s16 }
 0xe8b   : >> { %1804 = vmatmul.msk.bf16.vlgmr.msra.gmra.mxu0 %vm762_vm6, %v1339_v40  ;;  %1469 = vmatpush.bf16.msra.mxu1 %v1846_v48  ;;  %v1843_v61 = vld [vmem:[%s1428_s1] sm:$0xff]  ;;  %s1498_s17 = sadd.s32 (%p1335_p1), %s2535_s27, %s1826_s18  ;;  %s3313_s24 = sld [smem:[#allocation36_spill]] (%p1335_p1) }
 0xe8c   : > { %s1827_s0 = sshll.u32 (%p1335_p1), %s1498_s17, 3  ;;  %s1488_s29 = scalar_lea.sflag (%p1335_p1), [#allocation9], %s616_s4 }
 0xe8f   : >> { %1470 = vmatpush.bf16.msra.mxu1 %v1845_v53  ;;  %v2220_v31 = vld [vmem:[%s3311_s20] ss:$0 sm:$0xff] (%p1335_p1) }
 0xe91   : > { %s3314_s1 = smov (%p1335_p1), %s3313_s24  ;;  %s1500_s26 = scalar_lea.hbm (%p1335_p1), %s3313_s24, %s1827_s0 }
 0xe92   : > { %s1504_s30 = sshll.u32 (%p1335_p1), %s1500_s26, 4  ;;  %s2361_s14 = scalar_lea.hbm (%p1335_p1), %s3314_s1, 32  ;;  %s1505_s30 = int_to_ptr.hbm [resolvable:$true] %s1504_s30 }
 0xe93   : >> { %1471 = vmatpush.bf16.msra.mxu1 %v1844_v57  ;;  %s2355_s19 = sshra.s32 (%p1335_p1), %s1505_s30, 4  ;;  %s2356_s19 = int_to_ptr.hbm [resolvable:$true] %s2355_s19 }
 0xe94   : > { %s2357_s28 = scalar_lea.hbm (%p1335_p1), %s2356_s19, 8  ;;  %p2362_p6 = scmp.lt.s32.totalorder (%p1335_p1), %s2356_s19, %s3314_s1 }
 0xe95   : > { %p2358_p2 = scmp.ne.s32.totalorder (%p1335_p1), %s2356_s19, %s2357_s28  ;;  %p2363_p7 = scmp.lt.s32.totalorder (%p1335_p1), %s2361_s14, %s2357_s28 }
 0xe97   : >> { %1472 = vmatpush.bf16.msra.mxu1 %v1843_v61  ;;  %p2359_p4 = pnand (%p1335_p1), %p2358_p2, %p2813_p3  ;;  %p2364_p9 = por (%p1335_p1), %p2363_p7, %p2362_p6 }
 0xe99   : > { %p2360_p5 = pneg (%p1335_p1), %p2359_p4 }
 0xe9b   : > { %p2365_p10 = pnand (%p1335_p1), %p2364_p9, %p2360_p5 }
 0xf08   : >> { %v1376_v42 = vpop.f32.mrf.mxu0 }
 0xf09   : >> { %v1377_v43 = vadd.f32 %v2217_v41, %v1376_v42 }
 0xf0b   : >> { %v1381_v44 = vmul.f32 0.70710677, %v1377_v43  ;;  %v1380_v1 = vmul.f32 0.5, %v1377_v43 }
 0xf0d   : >> { %v1382_v45 = vmul.f32 %v1381_v44, %v1381_v44 }
 0xf0f   : >> { %v1383_v46 = vmin.f32 %v1382_v45, 16.0 }
 0xf10   : >> { %v1378_v47 = vpop.f32.mrf.mxu0 }
 0xf11   : >> { %v1384_v49 = vmul.f32 2.1237322e-06, %v1383_v46  ;;  %v1395_v50 = vmul.f32 3.8918573e-05, %v1383_v46 }
 0xf13   : >> { %v1385_v51 = vadd.f32 0.00028619796, %v1384_v49  ;;  %v1396_v52 = vadd.f32 0.001143296, %v1395_v50 }
 0xf15   : >> { %v1386_v55 = vmul.f32 %v1385_v51, %v1383_v46  ;;  %v1397_v56 = vmul.f32 %v1396_v52, %v1383_v46 }
 0xf17   : >> { %v1398_v58 = vadd.f32 0.014752088, %v1397_v56  ;;  %v1387_v59 = vadd.f32 0.0036580483, %v1386_v55 }
 0xf19   : >> { %v1399_v60 = vmul.f32 %v1398_v58, %v1383_v46  ;;  %v1388_v63 = vmul.f32 %v1387_v59, %v1383_v46 }
 0xf1b   : >> { %v1400_v62 = vadd.f32 0.112945676, %v1399_v60  ;;  %v1389_v4 = vadd.f32 0.05243302, %v1388_v63 }
 0xf1d   : >> { %v1401_v2 = vmul.f32 %v1400_v62, %v1383_v46  ;;  %v1390_v7 = vmul.f32 %v1389_v4, %v1383_v46 }
 0xf1f   : >> { %v1402_v3 = vadd.f32 0.4994258, %v1401_v2  ;;  %v1391_v8 = vadd.f32 0.18741608, %v1390_v7 }
 0xf21   : >> { %v1403_v5 = vmul.f32 %v1402_v3, %v1383_v46  ;;  %v1392_v10 = vmul.f32 %v1391_v8, %v1383_v46 }
 0xf23   : >> { %v1404_v6 = vadd.f32 1.0, %v1403_v5  ;;  %v1393_v12 = vadd.f32 1.1283791, %v1392_v10 }
 0xf25   : >> { %2218 = vrcp.f32 %v1404_v6  ;;  %v1416_v11 = vand.u32 2147483648, %v1404_v6  ;;  %v1414_v14 = vand.u32 2147483647, %v1404_v6  ;;  %vm1410_vm10 = vweird.f32 %v1404_v6 }
 0xf26   : >> { %v1394_v19 = vmul.f32 %v1393_v12, %v1381_v44 }
 0xf27   : >> { %v1417_v16 = vor.u32 1.1754944e-38, %v1416_v11  ;;  %vm1415_vm13 = vcmp.eq.f32.partialorder %v1414_v14, 8.507059e+37 }
 0xf2b   : >> { %v2219_v9 = vpop.eup %2218 }
 0xf2c   : >> { %v1406_v17 = vmul.f32 %v2219_v9, %v1404_v6  ;;  %vm1411_vm11 = vweird.f32 %v2219_v9 }
 0xf2d   : >> { %vm1412_vm12 = vmor %vm1410_vm10, %vm1411_vm11 }
 0xf2e   : >> { %v1407_v18 = vsub.f32 1.0, %v1406_v17 }
 0xf30   : >> { %v1408_v13 = vmul.f32 %v2219_v9, %v1407_v18 }
 0xf32   : >> { %v1409_v15 = vadd.f32 %v2219_v9, %v1408_v13 }
 0xf34   : >> { %v1413_v20 = vsel %vm1412_vm12, %v2219_v9, %v1409_v15 }
 0xf35   : >> { %v1418_v21 = vsel %vm1415_vm13, %v1417_v16, %v1413_v20 }
 0xf36   : >> { %v1419_v0 = vmul.f32 %v1418_v21, %v1394_v19 }
 0xf38   : >> { %v1805_v22 = vclamps-f32 %v1419_v0, 1.0 }
 0xf3a   : >> { %v1422_v23 = vadd.f32 1.0, %v1805_v22 }
 0xf3c   : >> { %v1423_v24 = vmul.f32 %v1422_v23, %v1380_v1 }
 0xf3e   : >> { %v1425_v25 = vpack.c.bf16 %v1423_v24, %v1423_v24 }
 0xf40   : >> { %1824 = vmatmul.msk.bf16.vlgmr.msra.gmra.mxu1 %vm1461_vm14, %v1425_v25 }
 0xfbd   : >> { %v1474_v27 = vpop.f32.mrf.mxu1 }
 0xfbe   : >> { %v1478_v28 = vadd.f32 %v1474_v27, %v1424_v26 }
 0xfc0   : >> { %1479 = vst.msk [vmem:[#allocation6] sm:$0xff] %vm762_vm6, %v1478_v28 }
 0xfc5   : >> { %v1476_v29 = vpop.f32.mrf.mxu1  ;;  %1337 = sbr.rel (!%p1335_p1) target bundleno = 3713 (0xe81), region = 256 }
 0xfc7   : > { %v1480_v30 = vld [vmem:[#allocation6] sm:$0xff] (%p1335_p1) }
 0xfc8   : > { %v1485_v32 = vadd.f32 (%p1335_p1), %v2220_v31, %v1480_v30 }
 0xfca   : > { %1486 = vst.msk [vmem:[%s618_s15] sm:$0xff] %vm762_vm6, %v1485_v32 }
 0xfcb   : > { %2368 = shalt.err (!%p2365_p10)
}
 0xfcc   : > { %1863 = dma.vmem_to_hbm [thread:$0]  (%p2813_p3), %s1503_s16, 128, %s1505_s30, %s1488_s29  }
 0xfcd PF: > { %s3315_s4 = sld [smem:[#allocation24_spill]] }
 0xfce   : > { %s3316_s17 = sld [smem:[#allocation20_spill]] }
 0xfd3   : > { %p1890_p11 = scmp.ge.s32.totalorder %s3315_s4, 2 }
 0xfd4   : > { %s1516_s23 = sand.u32 1, %s3316_s17  }
 0xfd5   : > { %p1879_p12 = pnand %p1890_p11, %p2822_p8  ;;  %s1517_s21 = scalar_lea.sflag [#allocation9], %s1516_s23 }
 0xfd7   : > { %p1880_p13 = pneg %p1879_p12 }
 0xfd9   : > { %2518 = dma.done.wait (%p1880_p13), %s1517_s21, 128  }
 0xfda   : > { %2520 = vsyncadd (%p1880_p13), %s1517_s21, 4294967168  ;;  %s33_s30 = sadd.s32 1, %s3315_s4   ;;  %s3318_s26 = sld [smem:[#allocation21_spill]] }
 0xfdb   : > { %p30_p0 = scmp.ge.s32.totalorder %s33_s30, 6   ;;  %s3319_s19 = sld [smem:[#allocation29_spill]] }
 0xfdc   : > { %s3320_s27 = sld [smem:[#allocation22_spill]]  ;;  %s3324_s24 = smov %s2527_s25 }
 0xfdd   : > { %s3321_s28 = sld [smem:[#allocation23_spill]]  ;;  %32 = sbr.rel (!%p30_p0) target bundleno = 16 (0x10), region = 267 }
 0xfde   : > { %s3322_s29 = sld [smem:[#allocation25_spill]] }
 0xfdf   : > { %s3323_s0 = sld [smem:[#allocation27_spill]] }
 0xfe0   : > { %s3325_s25 = smov %s3318_s26 }
 0xfe1   : > { %s3326_s26 = smov %s3319_s19 }
 0xfe2   :  { %1523 = vsyncpa [#allocation8], 1 }
 0xfe3   :  { %1525 = vsyncpa [#allocation8 + $0x1], 1 }
 0xfe4   :  { %1526 = vsyncpa [#allocation11], 1 }
 0xfe5   :  { %1527 = vsyncpa [#allocation14], 1 }
 0xfe6   :  { %1528 = vsyncpa [#allocation9], 1 }
 0xfe7   :  { %1530 = vsyncpa [#allocation9 + $0x1], 1 }

</bundles_post_ra>
